<compile_context>
chip_gen: v6e
topology: v6e:2x2x1
jax: 0.10.0
libtpu: 0.0.40
codegen_flags: <defaults>
</compile_context>

<pallas_src>
import jax
import jax.numpy as jnp
from jax.experimental import pallas as pl
from jax.experimental.pallas import tpu as pltpu


LANE_PAD = 128  # pad output features to a full lane width


def knet_kernel(x_ref, w1_ref, b1_ref, w23_ref, b23_ref, o_ref):
    # MXU pass 1: dense1 + bias + ReLU (f32 accumulation regardless of input dtype)
    h1 = jnp.dot(x_ref[...], w1_ref[...], preferred_element_type=jnp.float32)
    h1 = jnp.maximum(h1 + b1_ref[...], 0.0)
    # MXU pass 2: fused dense2 @ dense3, output padded to 128 lanes
    out = jnp.dot(h1, w23_ref[...], preferred_element_type=jnp.float32) + b23_ref[...]
    o_ref[...] = out.astype(o_ref.dtype)


def _round_up(v, m):
    return ((v + m - 1) // m) * m


def prepare_knet_params(params, compute_dtype=jnp.float32):
    """One-time preprocessing (hoisted out of the per-call path).

    Folds dense2∘dense3 exactly (done in f32), pads the output features to 128
    lanes, and optionally casts the big streamed weight w1 to `compute_dtype`
    (use jnp.bfloat16 only if looser-than-1e-4 accuracy is acceptable).
    Returns ((w1, b1, w23p, b23p), cls).
    """
    w1, b1, w2, b2, w3, b3 = params
    hidden = w1.shape[1]
    cls = w3.shape[1]

    w23 = w2 @ w3                      # (256, cls) exact fold
    b23 = b2 @ w3 + b3                 # (1, cls)
    w23p = jnp.zeros((hidden, LANE_PAD), jnp.float32).at[:, :cls].set(w23)
    b23p = jnp.zeros((1, LANE_PAD), jnp.float32).at[:, :cls].set(b23)

    packed = (w1.astype(compute_dtype),
              b1.astype(jnp.float32),
              w23p, b23p)
    return packed, cls


def knet_forward(x_nchw, packed, cls, tm=None):
    """x_nchw: (B, 3, w, w). packed: output of prepare_knet_params. Returns (B, cls)."""
    w1, b1, w23p, b23p = packed
    B = x_nchw.shape[0]
    d_in, hidden = w1.shape            # (3072, 256)

    # Flatten exactly like torch.nn.Flatten on NCHW (row-major); stream x in
    # the same dtype as w1 (f32 by default, bf16 if the caller opted in).
    x_flat = x_nchw.reshape(B, -1).astype(w1.dtype)

    # Batch tile:
    #  * big B      -> 512 rows (long DMAs, low per-step overhead)
    #  * moderate B -> at least 2 tiles so both v7x TensorCores get work
    #  * tiny B     -> one 8-row tile
    if tm is None:
        tm = 8 if B <= 8 else min(512, _round_up(-(-B // 2), 8))
    tm = _round_up(tm, 8)

    # Avoid the full HBM re-copy of x for non-divisible B: only pad when a
    # single tile exceeds B (tiny batches -> a few-KiB copy). Otherwise the
    # tail tile is a partial block: Pallas clips the read (garbage rows are
    # per-row independent and sliced off) and masks the out-of-bounds store.
    b_rows = B
    if B < tm:
        b_rows = tm
        x_flat = jnp.zeros((b_rows, d_in), x_flat.dtype).at[:B].set(x_flat)
    grid = (pl.cdiv(b_rows, tm),)

    rows = grid[0] * tm
    flops = 2 * rows * d_in * hidden + 2 * rows * hidden * LANE_PAD
    bytes_accessed = int(
        B * d_in * x_flat.dtype.itemsize          # x in (dominant stream)
        + w1.size * w1.dtype.itemsize             # resident weights
        + b1.size * 4 + w23p.size * 4 + b23p.size * 4
        + B * LANE_PAD * 4)                       # out

    out = pl.pallas_call(
        knet_kernel,
        out_shape=jax.ShapeDtypeStruct((b_rows, LANE_PAD), jnp.float32),
        grid=grid,
        in_specs=[
            pl.BlockSpec((tm, d_in), lambda i: (i, 0)),   # x streams per batch tile
            pl.BlockSpec(w1.shape, lambda i: (0, 0)),     # weights stay VMEM-resident
            pl.BlockSpec(b1.shape, lambda i: (0, 0)),
            pl.BlockSpec(w23p.shape, lambda i: (0, 0)),
            pl.BlockSpec(b23p.shape, lambda i: (0, 0)),
        ],
        out_specs=pl.BlockSpec((tm, LANE_PAD), lambda i: (i, 0)),
        compiler_params=pltpu.CompilerParams(
            dimension_semantics=("parallel",),            # batch tiles are independent
            vmem_limit_bytes=48 << 20,                    # TM=512 f32 working set ~20 MiB
        ),
        cost_estimate=pl.CostEstimate(
            flops=flops, transcendentals=0, bytes_accessed=bytes_accessed),
    )(x_flat, w1, b1, w23p, b23p)

    return out[:B, :cls]


def init_params(key, w=32, decompose=100, cls=9):
    """Deterministic init mimicking torch.nn.Linear (uniform +-1/sqrt(fan_in)).
    Weights stored transposed vs PyTorch, i.e. (in, out); biases as (1, out)."""
    d_in = w * w * 3
    dims = [(d_in, 256), (256, decompose), (decompose, cls)]
    params = []
    for (fi, fo) in dims:
        key, kw, kb = jax.random.split(key, 3)
        bound = 1.0 / jnp.sqrt(fi)
        W = jax.random.uniform(kw, (fi, fo), jnp.float32, -bound, bound)
        b = jax.random.uniform(kb, (1, fo), jnp.float32, -bound, bound)
        params += [W, b]
    return tuple(params)


def knet_reference(x_nchw, params):
    """Pure-JAX reference (unfused, unpadded) for correctness checking."""
    w1, b1, w2, b2, w3, b3 = params
    x = x_nchw.reshape(x_nchw.shape[0], -1)
    h1 = jnp.maximum(x @ w1 + b1, 0.0)
    h2 = h1 @ w2 + b2
    return h2 @ w3 + b3


if __name__ == "__main__":
    key = jax.random.PRNGKey(0)
    key, kx = jax.random.split(key)

    B, C, W = 2, 3, 32  # dense1 requires w=32 (3*32*32 = 3072 input features)
    x = jax.random.normal(kx, (B, C, W, W), jnp.float32)

    params = init_params(key, w=W, decompose=100, cls=9)
    packed, cls = prepare_knet_params(params)   # one-time fold + lane padding

    out = knet_forward(x, packed, cls)
    out = jax.block_until_ready(out)

    ref = knet_reference(x, params)
    assert out.shape == (B, cls), out.shape
    assert jnp.allclose(out, ref, atol=1e-4, rtol=1e-4), "mismatch vs reference"

    print("KERNEL_OK")
</pallas_src>

<mosaic_0001>
module attributes {stable_mosaic.version = 11 : i64} {
  func.func @knet_kernel(%arg0: i32, %arg1: memref<8x3072xf32, #tpu.memory_space<vmem>>, %arg2: memref<3072x256xf32, #tpu.memory_space<vmem>>, %arg3: memref<1x256xf32, #tpu.memory_space<vmem>>, %arg4: memref<256x128xf32, #tpu.memory_space<vmem>>, %arg5: memref<1x128xf32, #tpu.memory_space<vmem>>, %arg6: memref<8x128xf32, #tpu.memory_space<vmem>>) attributes {dimension_semantics = [#tpu.dimension_semantics<parallel>], iteration_bounds = array<i64: 1>, scalar_prefetch = 0 : i64, scratch_operands = 0 : i64, tpu.core_type = #tpu.core_type<tc>, window_params = [{transform_indices = @transform_0, window_bounds = array<i64: 8, 3072>}, {pipeline_mode = #tpu.pipeline_mode<synchronous>, transform_indices = @transform_1, window_bounds = array<i64: 3072, 256>}, {pipeline_mode = #tpu.pipeline_mode<synchronous>, transform_indices = @transform_2, window_bounds = array<i64: 1, 256>}, {pipeline_mode = #tpu.pipeline_mode<synchronous>, transform_indices = @transform_3, window_bounds = array<i64: 256, 128>}, {pipeline_mode = #tpu.pipeline_mode<synchronous>, transform_indices = @transform_4, window_bounds = array<i64: 1, 128>}, {transform_indices = @transform_5, window_bounds = array<i64: 8, 128>}]} {
    %c0 = arith.constant 0 : index
    %c0_0 = arith.constant 0 : index
    %0 = vector.load %arg1[%c0, %c0_0] : memref<8x3072xf32, #tpu.memory_space<vmem>>, vector<8x3072xf32>
    %c0_1 = arith.constant 0 : index
    %c0_2 = arith.constant 0 : index
    %1 = vector.load %arg2[%c0_1, %c0_2] : memref<3072x256xf32, #tpu.memory_space<vmem>>, vector<3072x256xf32>
    %cst = arith.constant dense<0.000000e+00> : vector<8x256xf32>
    %2 = tpu.matmul %0, %1, %cst {dimension_numbers = #tpu.dot_dimension_numbers<[1], [0], [0], [1], [0, 0, 1, 1], [], []>} : vector<8x3072xf32>, vector<3072x256xf32>, vector<8x256xf32> -> vector<8x256xf32>
    %c0_3 = arith.constant 0 : index
    %c0_4 = arith.constant 0 : index
    %3 = vector.load %arg3[%c0_3, %c0_4] : memref<1x256xf32, #tpu.memory_space<vmem>>, vector<1x256xf32>
    %4 = vector.broadcast %3 : vector<1x256xf32> to vector<8x256xf32>
    %5 = arith.addf %2, %4 : vector<8x256xf32>
    %cst_5 = arith.constant 0.000000e+00 : f32
    %6 = vector.broadcast %cst_5 : f32 to vector<8x256xf32>
    %7 = arith.maximumf %5, %6 : vector<8x256xf32>
    %c0_6 = arith.constant 0 : index
    %c0_7 = arith.constant 0 : index
    %8 = vector.load %arg4[%c0_6, %c0_7] : memref<256x128xf32, #tpu.memory_space<vmem>>, vector<256x128xf32>
    %cst_8 = arith.constant dense<0.000000e+00> : vector<8x128xf32>
    %9 = tpu.matmul %7, %8, %cst_8 {dimension_numbers = #tpu.dot_dimension_numbers<[1], [0], [0], [1], [0, 0, 1, 1], [], []>} : vector<8x256xf32>, vector<256x128xf32>, vector<8x128xf32> -> vector<8x128xf32>
    %c0_9 = arith.constant 0 : index
    %c0_10 = arith.constant 0 : index
    %10 = vector.load %arg5[%c0_9, %c0_10] : memref<1x128xf32, #tpu.memory_space<vmem>>, vector<1x128xf32>
    %11 = vector.broadcast %10 : vector<1x128xf32> to vector<8x128xf32>
    %12 = arith.addf %9, %11 : vector<8x128xf32>
    %c0_11 = arith.constant 0 : index
    %c0_12 = arith.constant 0 : index
    %13 = vector.load %arg6[%c0_11, %c0_12] : memref<8x128xf32, #tpu.memory_space<vmem>>, vector<8x128xf32>
    tpu.vector_store %arg6[%c0_11, %c0_12], %12 {strides = array<i32>} : memref<8x128xf32, #tpu.memory_space<vmem>>, vector<8x128xf32>,
    return
  }
  func.func @transform_0(%arg0: i32) -> (i32, i32) {
    %c0_i32 = arith.constant 0 : i32
    %c0_i32_0 = arith.constant 0 : i32
    return %arg0, %c0_i32 : i32, i32
  }
  func.func @transform_1(%arg0: i32) -> (i32, i32) {
    %c0_i32 = arith.constant 0 : i32
    %c0_i32_0 = arith.constant 0 : i32
    %c0_i32_1 = arith.constant 0 : i32
    return %c0_i32, %c0_i32_0 : i32, i32
  }
  func.func @transform_2(%arg0: i32) -> (i32, i32) {
    %c0_i32 = arith.constant 0 : i32
    %c0_i32_0 = arith.constant 0 : i32
    %c0_i32_1 = arith.constant 0 : i32
    return %c0_i32, %c0_i32_0 : i32, i32
  }
  func.func @transform_3(%arg0: i32) -> (i32, i32) {
    %c0_i32 = arith.constant 0 : i32
    %c0_i32_0 = arith.constant 0 : i32
    %c0_i32_1 = arith.constant 0 : i32
    return %c0_i32, %c0_i32_0 : i32, i32
  }
  func.func @transform_4(%arg0: i32) -> (i32, i32) {
    %c0_i32 = arith.constant 0 : i32
    %c0_i32_0 = arith.constant 0 : i32
    %c0_i32_1 = arith.constant 0 : i32
    return %c0_i32, %c0_i32_0 : i32, i32
  }
  func.func @transform_5(%arg0: i32) -> (i32, i32) {
    %c0_i32 = arith.constant 0 : i32
    %c0_i32_0 = arith.constant 0 : i32
    return %arg0, %c0_i32 : i32, i32
  }
}

</mosaic_0001>

<bundles_post_ra>
// kernel: tpu_custom_call.1
= control target key start
LH: loop header
LB: loop body
LE: loop exit
PB: predicated region body
PF: predicated region fallthrough
CT: control target
= control target key end

     0   :  { %10 = vsyncpa [#allocation3], 0  ;;  %s2100_s0 = inlined_call_operand.hbm [shape: f32[8,3072], index: 0, kind: input, shape index: {}]   ;;  %s2101_s1 = inlined_call_operand.hbm [shape: f32[3072,256], index: 1, kind: input, shape index: {}]   ;;  %s2102_s2 = inlined_call_operand.hbm [shape: f32[1,256], index: 2, kind: input, shape index: {}]   ;;  %s2103_s3 = inlined_call_operand.hbm [shape: f32[256,128], index: 3, kind: input, shape index: {}]   ;;  %s2104_s4 = inlined_call_operand.hbm [shape: f32[1,128], index: 4, kind: input, shape index: {}]   ;;  %s2105_s5 = inlined_call_operand.hbm [shape: f32[8,128], index: 5, kind: output, shape index: {}]  }
   0x1   :  { %11 = vsyncpa [#allocation6], 0 }
   0x2   :  { %12 = vsyncpa [#allocation9], 0 }
   0x3   :  { %13 = vsyncpa [#allocation4], 0  ;;  %s2042_s18 = smov [#allocation5]  }
   0x4   :  { %s29_s19 = sshll.u32 %s2042_s18, 4  ;;  %s30_s19 = int_to_ptr.vmem [resolvable:$true] %s29_s19 }
   0x5   :  { %s1922_s20 = scalar_lea.vmem %s30_s19, 98304  ;;  %p1927_p1 = scmp.lt.s32.totalorder %s30_s19, %s30_s19 }
   0x6   :  { %p1923_p0 = scmp.ne.s32.totalorder %s30_s19, %s1922_s20  ;;  %p1928_p2 = scmp.lt.s32.totalorder %s1922_s20, %s1922_s20 }
   0x8   :  { %p1929_p3 = por %p1928_p2, %p1927_p1 }
   0xa   :  { %p1930_p4 = pnand %p1929_p3, %p1923_p0 }
   0xc   :  { %1933 = shalt.err (!%p1930_p4)
}
   0xd   :  { %s2043_s21 = smov 256   ;;  %s2044_s22 = smov 16  }
   0xe   :  { %35 = dma.hbm_to_vmem [thread:$0]  %s2101_s1, 98304, %s30_s19, [#allocation6], %s2043_s21, %s2043_s21, %s2044_s22  }
   0xf   :  { %s2045_s25 = smov [#allocation8]  }
  0x10   :  { %s51_s26 = sshll.u32 %s2045_s25, 4  ;;  %s52_s26 = int_to_ptr.vmem [resolvable:$true] %s51_s26 }
  0x11   :  { %s1942_s27 = scalar_lea.vmem %s52_s26, 4096  ;;  %p1947_p6 = scmp.lt.s32.totalorder %s52_s26, %s52_s26 }
  0x12   :  { %p1943_p5 = scmp.ne.s32.totalorder %s52_s26, %s1942_s27  ;;  %p1948_p7 = scmp.lt.s32.totalorder %s1942_s27, %s1942_s27 }
  0x14   :  { %p1949_p8 = por %p1948_p7, %p1947_p6 }
  0x16   :  { %p1950_p9 = pnand %p1949_p8, %p1943_p5 }
  0x18   :  { %1953 = shalt.err (!%p1950_p9)
}
  0x19   :  { %s2046_s28 = smov 128   ;;  %s2047_s29 = smov 8  }
  0x1a   :  { %57 = dma.hbm_to_vmem [thread:$0]  %s2103_s3, 4096, %s52_s26, [#allocation9], %s2046_s28, %s2046_s28, %s2047_s29  }
  0x1b   :  { %s2048_s7 = smov [#allocation2]   ;;  %s2049_s9 = smov [#allocation7]  }
  0x1c   :  { %s20_s8 = sshll.u32 %s2048_s7, 4  ;;  %s42_s1 = sshll.u32 %s2049_s9, 4  ;;  %s21_s8 = int_to_ptr.vmem [resolvable:$true] %s20_s8  ;;  %s43_s1 = int_to_ptr.vmem [resolvable:$true] %s42_s1 }
  0x1d   :  { %s1962_s10 = scalar_lea.vmem %s21_s8, 3072  ;;  %p1967_p11 = scmp.lt.s32.totalorder %s21_s8, %s21_s8 }
  0x1e   :  { %p1963_p10 = scmp.ne.s32.totalorder %s21_s8, %s1962_s10  ;;  %p1968_p12 = scmp.lt.s32.totalorder %s1962_s10, %s1962_s10 }
  0x20   :  { %p1969_p13 = por %p1968_p12, %p1967_p11 }
  0x22   :  { %p1970_p0 = pnand %p1969_p13, %p1963_p10 }
  0x24   :  { %1973 = shalt.err (!%p1970_p0)
}
  0x25   :  { %23 = dma.hbm_to_vmem [thread:$0]  %s2100_s0, 3072, %s21_s8, [#allocation3]  }
  0x26   :  { %s1982_s13 = scalar_lea.vmem %s43_s1, 32  ;;  %p1987_p2 = scmp.lt.s32.totalorder %s43_s1, %s43_s1 }
  0x27   :  { %p1983_p1 = scmp.ne.s32.totalorder %s43_s1, %s1982_s13  ;;  %p1988_p3 = scmp.lt.s32.totalorder %s1982_s13, %s1982_s13 }
  0x29   :  { %p1989_p4 = por %p1988_p3, %p1987_p2 }
  0x2b   :  { %p1990_p5 = pnand %p1989_p4, %p1983_p1 }
  0x2d   :  { %1993 = shalt.err (!%p1990_p5)
}
  0x2e   :  { %45 = dma.hbm_to_vmem [thread:$0]  %s2102_s2, 32, %s43_s1, [#allocation6]  }
  0x2f   :  { %s2050_s15 = smov [#allocation10]  }
  0x30   :  { %s64_s16 = sshll.u32 %s2050_s15, 4  ;;  %s65_s16 = int_to_ptr.vmem [resolvable:$true] %s64_s16 }
  0x31   :  { %s2002_s17 = scalar_lea.vmem %s65_s16, 16  ;;  %s2006_s18 = scalar_lea.vmem %s65_s16, 32 }
  0x32   :  { %p2003_p6 = scmp.ne.s32.totalorder %s65_s16, %s2002_s17  ;;  %p2007_p7 = scmp.lt.s32.totalorder %s65_s16, %s65_s16 }
  0x33   :  { %p2008_p8 = scmp.lt.s32.totalorder %s2006_s18, %s2002_s17 }
  0x35   :  { %p2009_p9 = por %p2008_p8, %p2007_p7 }
  0x37   :  { %p2010_p10 = pnand %p2009_p9, %p2003_p6 }
  0x39   :  { %2013 = shalt.err (!%p2010_p10)
}
  0x3a   :  { %67 = dma.hbm_to_vmem [thread:$0]  %s2104_s4, 16, %s65_s16, [#allocation9]  }
  0x3b   :  { %2034 = dma.done.wait [#allocation3], 3072  }
  0x3c   :  { %2035 = vsyncadd [#allocation3], 4294964224 }
  0x3d   :  { %2036 = dma.done.wait [#allocation6], 98336  }
  0x3e   :  { %2037 = vsyncadd [#allocation6], 4294868960 }
  0x3f   :  { %2038 = dma.done.wait [#allocation9], 4112  }
  0x40   :  { %2039 = vsyncadd [#allocation9], 4294963184  ;;  %v138_v0 = vld [vmem:[#allocation5 + $0xf8] sm:$0xff]  ;;  %v137_v2 = vld [vmem:[#allocation5 + $0xf0] sm:$0xff]  ;;  %s2051_s2 = smov [#allocation11]  }
  0x41   :  { %v202_v1 = vld [vmem:[#allocation5 + $0x2f8] sm:$0xff]  ;;  %887 = vmatprep.subr.mxu0 %v138_v0  ;;  %v201_v3 = vld [vmem:[#allocation5 + $0x2f0] sm:$0xff]  ;;  %v136_v4 = vld [vmem:[#allocation5 + $0xe8] sm:$0xff]  ;;  %s1857_s4 = sshll.u32 %s2051_s2, 4  ;;  %s1858_s4 = int_to_ptr.vmem [resolvable:$true] %s1857_s4 }
  0x42   :  { %958 = vmatprep.subr.mxu1 %v202_v1  ;;  %v200_v5 = vld [vmem:[#allocation5 + $0x2e8] sm:$0xff]  ;;  %888 = vmatpush1.msra.mxu0 %v137_v2  ;;  %v135_v6 = vld [vmem:[#allocation5 + $0xe0] sm:$0xff]  ;;  %v134_v8 = vld [vmem:[#allocation5 + $0xd8] sm:$0xff]  ;;  %s2014_s20 = scalar_lea.vmem %s1858_s4, 128  ;;  %p2019_p12 = scmp.lt.s32.totalorder %s1858_s4, %s1858_s4 }
  0x43   :  { %959 = vmatpush1.msra.mxu1 %v201_v3  ;;  %v199_v7 = vld [vmem:[#allocation5 + $0x2e0] sm:$0xff]  ;;  %889 = vmatprep.subr.mxu0 %v136_v4  ;;  %v198_v9 = vld [vmem:[#allocation5 + $0x2d8] sm:$0xff]  ;;  %v133_v10 = vld [vmem:[#allocation5 + $0xd0] sm:$0xff]  ;;  %p2015_p11 = scmp.ne.s32.totalorder %s1858_s4, %s2014_s20  ;;  %p2020_p13 = scmp.lt.s32.totalorder %s2014_s20, %s2014_s20 }
  0x44   :  { %960 = vmatprep.subr.mxu1 %v200_v5  ;;  %v197_v11 = vld [vmem:[#allocation5 + $0x2d0] sm:$0xff]  ;;  %890 = vmatpush1.msra.mxu0 %v135_v6  ;;  %v132_v12 = vld [vmem:[#allocation5 + $0xc8] sm:$0xff]  ;;  %v131_v14 = vld [vmem:[#allocation5 + $0xc0] sm:$0xff] }
  0x45   :  { %961 = vmatpush1.msra.mxu1 %v199_v7  ;;  %v196_v13 = vld [vmem:[#allocation5 + $0x2c8] sm:$0xff]  ;;  %891 = vmatprep.subr.mxu0 %v134_v8  ;;  %v195_v15 = vld [vmem:[#allocation5 + $0x2c0] sm:$0xff]  ;;  %v130_v16 = vld [vmem:[#allocation5 + $0xb8] sm:$0xff]  ;;  %p2021_p0 = por %p2020_p13, %p2019_p12 }
  0x46   :  { %962 = vmatprep.subr.mxu1 %v198_v9  ;;  %892 = vmatpush1.msra.mxu0 %v133_v10  ;;  %v194_v17 = vld [vmem:[#allocation5 + $0x2b8] sm:$0xff]  ;;  %v129_v18 = vld [vmem:[#allocation5 + $0xb0] sm:$0xff]  ;;  %v128_v20 = vld [vmem:[#allocation5 + $0xa8] sm:$0xff] }
  0x47   :  { %963 = vmatpush1.msra.mxu1 %v197_v11  ;;  %893 = vmatprep.subr.mxu0 %v132_v12  ;;  %v193_v19 = vld [vmem:[#allocation5 + $0x2b0] sm:$0xff]  ;;  %v192_v21 = vld [vmem:[#allocation5 + $0x2a8] sm:$0xff]  ;;  %v127_v22 = vld [vmem:[#allocation5 + $0xa0] sm:$0xff]  ;;  %p2022_p1 = pnand %p2021_p0, %p2015_p11 }
  0x48   :  { %964 = vmatprep.subr.mxu1 %v196_v13  ;;  %894 = vmatpush1.msra.mxu0 %v131_v14  ;;  %v191_v23 = vld [vmem:[#allocation5 + $0x2a0] sm:$0xff]  ;;  %v126_v24 = vld [vmem:[#allocation5 + $0x98] sm:$0xff]  ;;  %v125_v26 = vld [vmem:[#allocation5 + $0x90] sm:$0xff] }
  0x49   :  { %965 = vmatpush1.msra.mxu1 %v195_v15  ;;  %895 = vmatprep.subr.mxu0 %v130_v16  ;;  %v190_v25 = vld [vmem:[#allocation5 + $0x298] sm:$0xff]  ;;  %v189_v27 = vld [vmem:[#allocation5 + $0x290] sm:$0xff]  ;;  %v124_v28 = vld [vmem:[#allocation5 + $0x88] sm:$0xff] }
  0x4a   :  { %966 = vmatprep.subr.mxu1 %v194_v17  ;;  %896 = vmatpush1.msra.mxu0 %v129_v18  ;;  %v188_v29 = vld [vmem:[#allocation5 + $0x288] sm:$0xff]  ;;  %v123_v30 = vld [vmem:[#allocation5 + $0x80] sm:$0xff]  ;;  %v122_v32 = vld [vmem:[#allocation5 + $0x78] sm:$0xff] }
  0x4b   :  { %967 = vmatpush1.msra.mxu1 %v193_v19  ;;  %897 = vmatprep.subr.mxu0 %v128_v20  ;;  %v187_v31 = vld [vmem:[#allocation5 + $0x280] sm:$0xff]  ;;  %v186_v33 = vld [vmem:[#allocation5 + $0x278] sm:$0xff]  ;;  %v121_v34 = vld [vmem:[#allocation5 + $0x70] sm:$0xff] }
  0x4c   :  { %968 = vmatprep.subr.mxu1 %v192_v21  ;;  %898 = vmatpush1.msra.mxu0 %v127_v22  ;;  %v185_v35 = vld [vmem:[#allocation5 + $0x270] sm:$0xff]  ;;  %v120_v36 = vld [vmem:[#allocation5 + $0x68] sm:$0xff]  ;;  %v119_v38 = vld [vmem:[#allocation5 + $0x60] sm:$0xff] }
  0x4d   :  { %969 = vmatpush1.msra.mxu1 %v191_v23  ;;  %899 = vmatprep.subr.mxu0 %v126_v24  ;;  %v184_v37 = vld [vmem:[#allocation5 + $0x268] sm:$0xff]  ;;  %v183_v39 = vld [vmem:[#allocation5 + $0x260] sm:$0xff]  ;;  %v118_v40 = vld [vmem:[#allocation5 + $0x58] sm:$0xff] }
  0x4e   :  { %970 = vmatprep.subr.mxu1 %v190_v25  ;;  %900 = vmatpush1.msra.mxu0 %v125_v26  ;;  %v182_v41 = vld [vmem:[#allocation5 + $0x258] sm:$0xff]  ;;  %v117_v42 = vld [vmem:[#allocation5 + $0x50] sm:$0xff]  ;;  %v116_v44 = vld [vmem:[#allocation5 + $0x48] sm:$0xff] }
  0x4f   :  { %971 = vmatpush1.msra.mxu1 %v189_v27  ;;  %901 = vmatprep.subr.mxu0 %v124_v28  ;;  %v181_v43 = vld [vmem:[#allocation5 + $0x250] sm:$0xff]  ;;  %v180_v45 = vld [vmem:[#allocation5 + $0x248] sm:$0xff]  ;;  %v115_v46 = vld [vmem:[#allocation5 + $0x40] sm:$0xff] }
  0x50   :  { %972 = vmatprep.subr.mxu1 %v188_v29  ;;  %902 = vmatpush1.msra.mxu0 %v123_v30  ;;  %v179_v47 = vld [vmem:[#allocation5 + $0x240] sm:$0xff]  ;;  %v114_v48 = vld [vmem:[#allocation5 + $0x38] sm:$0xff]  ;;  %v113_v50 = vld [vmem:[#allocation5 + $0x30] sm:$0xff] }
  0x51   :  { %973 = vmatpush1.msra.mxu1 %v187_v31  ;;  %903 = vmatprep.subr.mxu0 %v122_v32  ;;  %v178_v49 = vld [vmem:[#allocation5 + $0x238] sm:$0xff]  ;;  %v177_v51 = vld [vmem:[#allocation5 + $0x230] sm:$0xff]  ;;  %v112_v52 = vld [vmem:[#allocation5 + $0x28] sm:$0xff] }
  0x52   :  { %974 = vmatprep.subr.mxu1 %v186_v33  ;;  %904 = vmatpush1.msra.mxu0 %v121_v34  ;;  %v176_v53 = vld [vmem:[#allocation5 + $0x228] sm:$0xff]  ;;  %v111_v54 = vld [vmem:[#allocation5 + $0x20] sm:$0xff]  ;;  %v110_v56 = vld [vmem:[#allocation5 + $0x18] sm:$0xff] }
  0x53   :  { %975 = vmatpush1.msra.mxu1 %v185_v35  ;;  %905 = vmatprep.subr.mxu0 %v120_v36  ;;  %v175_v55 = vld [vmem:[#allocation5 + $0x220] sm:$0xff]  ;;  %v174_v57 = vld [vmem:[#allocation5 + $0x218] sm:$0xff]  ;;  %v109_v58 = vld [vmem:[#allocation5 + $0x10] sm:$0xff] }
  0x54   :  { %976 = vmatprep.subr.mxu1 %v184_v37  ;;  %906 = vmatpush1.msra.mxu0 %v119_v38  ;;  %v173_v59 = vld [vmem:[#allocation5 + $0x210] sm:$0xff]  ;;  %v108_v60 = vld [vmem:[#allocation5 + $0x8] sm:$0xff]  ;;  %v107_v62 = vld [vmem:[#allocation5] sm:$0xff] }
  0x55   :  { %977 = vmatpush1.msra.mxu1 %v183_v39  ;;  %907 = vmatprep.subr.mxu0 %v118_v40  ;;  %v172_v61 = vld [vmem:[#allocation5 + $0x208] sm:$0xff]  ;;  %v171_v63 = vld [vmem:[#allocation5 + $0x200] sm:$0xff]  ;;  %v170_v0 = vld [vmem:[#allocation5 + $0x1f8] sm:$0xff] }
  0x56   :  { %978 = vmatprep.subr.mxu1 %v182_v41  ;;  %908 = vmatpush1.msra.mxu0 %v117_v42  ;;  %v234_v1 = vld [vmem:[#allocation5 + $0x3f8] sm:$0xff]  ;;  %v169_v2 = vld [vmem:[#allocation5 + $0x1f0] sm:$0xff]  ;;  %v168_v4 = vld [vmem:[#allocation5 + $0x1e8] sm:$0xff] }
  0x57   :  { %979 = vmatpush1.msra.mxu1 %v181_v43  ;;  %909 = vmatprep.subr.mxu0 %v116_v44  ;;  %v233_v3 = vld [vmem:[#allocation5 + $0x3f0] sm:$0xff]  ;;  %v232_v5 = vld [vmem:[#allocation5 + $0x3e8] sm:$0xff]  ;;  %v167_v6 = vld [vmem:[#allocation5 + $0x1e0] sm:$0xff] }
  0x58   :  { %980 = vmatprep.subr.mxu1 %v180_v45  ;;  %910 = vmatpush1.msra.mxu0 %v115_v46  ;;  %v231_v7 = vld [vmem:[#allocation5 + $0x3e0] sm:$0xff]  ;;  %v166_v8 = vld [vmem:[#allocation5 + $0x1d8] sm:$0xff]  ;;  %v165_v10 = vld [vmem:[#allocation5 + $0x1d0] sm:$0xff] }
  0x59   :  { %981 = vmatpush1.msra.mxu1 %v179_v47  ;;  %911 = vmatprep.subr.mxu0 %v114_v48  ;;  %v230_v9 = vld [vmem:[#allocation5 + $0x3d8] sm:$0xff]  ;;  %v229_v11 = vld [vmem:[#allocation5 + $0x3d0] sm:$0xff]  ;;  %v164_v12 = vld [vmem:[#allocation5 + $0x1c8] sm:$0xff] }
  0x5a   :  { %982 = vmatprep.subr.mxu1 %v178_v49  ;;  %912 = vmatpush1.msra.mxu0 %v113_v50  ;;  %v228_v13 = vld [vmem:[#allocation5 + $0x3c8] sm:$0xff]  ;;  %v163_v14 = vld [vmem:[#allocation5 + $0x1c0] sm:$0xff]  ;;  %v162_v16 = vld [vmem:[#allocation5 + $0x1b8] sm:$0xff] }
  0x5b   :  { %983 = vmatpush1.msra.mxu1 %v177_v51  ;;  %913 = vmatprep.subr.mxu0 %v112_v52  ;;  %v227_v15 = vld [vmem:[#allocation5 + $0x3c0] sm:$0xff]  ;;  %v226_v17 = vld [vmem:[#allocation5 + $0x3b8] sm:$0xff]  ;;  %v161_v18 = vld [vmem:[#allocation5 + $0x1b0] sm:$0xff] }
  0x5c   :  { %984 = vmatprep.subr.mxu1 %v176_v53  ;;  %914 = vmatpush1.msra.mxu0 %v111_v54  ;;  %v225_v19 = vld [vmem:[#allocation5 + $0x3b0] sm:$0xff]  ;;  %v160_v20 = vld [vmem:[#allocation5 + $0x1a8] sm:$0xff]  ;;  %v159_v22 = vld [vmem:[#allocation5 + $0x1a0] sm:$0xff] }
  0x5d   :  { %985 = vmatpush1.msra.mxu1 %v175_v55  ;;  %915 = vmatprep.subr.mxu0 %v110_v56  ;;  %v224_v21 = vld [vmem:[#allocation5 + $0x3a8] sm:$0xff]  ;;  %v223_v23 = vld [vmem:[#allocation5 + $0x3a0] sm:$0xff]  ;;  %v158_v24 = vld [vmem:[#allocation5 + $0x198] sm:$0xff] }
  0x5e   :  { %986 = vmatprep.subr.mxu1 %v174_v57  ;;  %916 = vmatpush1.msra.mxu0 %v109_v58  ;;  %v222_v25 = vld [vmem:[#allocation5 + $0x398] sm:$0xff]  ;;  %v157_v26 = vld [vmem:[#allocation5 + $0x190] sm:$0xff]  ;;  %v156_v28 = vld [vmem:[#allocation5 + $0x188] sm:$0xff] }
  0x5f   :  { %987 = vmatpush1.msra.mxu1 %v173_v59  ;;  %917 = vmatprep.subr.mxu0 %v108_v60  ;;  %v221_v27 = vld [vmem:[#allocation5 + $0x390] sm:$0xff]  ;;  %v220_v29 = vld [vmem:[#allocation5 + $0x388] sm:$0xff]  ;;  %v155_v30 = vld [vmem:[#allocation5 + $0x180] sm:$0xff] }
  0x60   :  { %988 = vmatprep.subr.mxu1 %v172_v61  ;;  %918 = vmatpush1.msra.mxu0 %v107_v62  ;;  %v219_v31 = vld [vmem:[#allocation5 + $0x380] sm:$0xff]  ;;  %v154_v32 = vld [vmem:[#allocation5 + $0x178] sm:$0xff]  ;;  %v153_v34 = vld [vmem:[#allocation5 + $0x170] sm:$0xff] }
  0x61   :  { %989 = vmatpush1.msra.mxu1 %v171_v63  ;;  %919 = vmatprep.subr.mxu0 %v170_v0  ;;  %v218_v33 = vld [vmem:[#allocation5 + $0x378] sm:$0xff]  ;;  %v217_v35 = vld [vmem:[#allocation5 + $0x370] sm:$0xff]  ;;  %v152_v36 = vld [vmem:[#allocation5 + $0x168] sm:$0xff] }
  0x62   :  { %990 = vmatprep.subr.mxu1 %v234_v1  ;;  %920 = vmatpush2.msra.mxu0 %v169_v2  ;;  %v216_v37 = vld [vmem:[#allocation5 + $0x368] sm:$0xff]  ;;  %v151_v38 = vld [vmem:[#allocation5 + $0x160] sm:$0xff]  ;;  %v150_v40 = vld [vmem:[#allocation5 + $0x158] sm:$0xff] }
  0x63   :  { %991 = vmatpush2.msra.mxu1 %v233_v3  ;;  %921 = vmatprep.subr.mxu0 %v168_v4  ;;  %v215_v39 = vld [vmem:[#allocation5 + $0x360] sm:$0xff]  ;;  %v214_v41 = vld [vmem:[#allocation5 + $0x358] sm:$0xff]  ;;  %v149_v42 = vld [vmem:[#allocation5 + $0x150] sm:$0xff] }
  0x64   :  { %992 = vmatprep.subr.mxu1 %v232_v5  ;;  %922 = vmatpush2.msra.mxu0 %v167_v6  ;;  %v213_v43 = vld [vmem:[#allocation5 + $0x350] sm:$0xff]  ;;  %v148_v44 = vld [vmem:[#allocation5 + $0x148] sm:$0xff]  ;;  %v147_v46 = vld [vmem:[#allocation5 + $0x140] sm:$0xff] }
  0x65   :  { %993 = vmatpush2.msra.mxu1 %v231_v7  ;;  %923 = vmatprep.subr.mxu0 %v166_v8  ;;  %v212_v45 = vld [vmem:[#allocation5 + $0x348] sm:$0xff]  ;;  %v211_v47 = vld [vmem:[#allocation5 + $0x340] sm:$0xff]  ;;  %v146_v48 = vld [vmem:[#allocation5 + $0x138] sm:$0xff] }
  0x66   :  { %994 = vmatprep.subr.mxu1 %v230_v9  ;;  %924 = vmatpush2.msra.mxu0 %v165_v10  ;;  %v210_v49 = vld [vmem:[#allocation5 + $0x338] sm:$0xff]  ;;  %v145_v50 = vld [vmem:[#allocation5 + $0x130] sm:$0xff]  ;;  %v144_v52 = vld [vmem:[#allocation5 + $0x128] sm:$0xff] }
  0x67   :  { %995 = vmatpush2.msra.mxu1 %v229_v11  ;;  %925 = vmatprep.subr.mxu0 %v164_v12  ;;  %v209_v51 = vld [vmem:[#allocation5 + $0x330] sm:$0xff]  ;;  %v208_v53 = vld [vmem:[#allocation5 + $0x328] sm:$0xff]  ;;  %v143_v54 = vld [vmem:[#allocation5 + $0x120] sm:$0xff] }
  0x68   :  { %996 = vmatprep.subr.mxu1 %v228_v13  ;;  %926 = vmatpush2.msra.mxu0 %v163_v14  ;;  %v207_v55 = vld [vmem:[#allocation5 + $0x320] sm:$0xff]  ;;  %v142_v56 = vld [vmem:[#allocation5 + $0x118] sm:$0xff]  ;;  %v141_v58 = vld [vmem:[#allocation5 + $0x110] sm:$0xff] }
  0x69   :  { %997 = vmatpush2.msra.mxu1 %v227_v15  ;;  %927 = vmatprep.subr.mxu0 %v162_v16  ;;  %v206_v57 = vld [vmem:[#allocation5 + $0x318] sm:$0xff]  ;;  %v205_v59 = vld [vmem:[#allocation5 + $0x310] sm:$0xff]  ;;  %v140_v60 = vld [vmem:[#allocation5 + $0x108] sm:$0xff] }
  0x6a   :  { %998 = vmatprep.subr.mxu1 %v226_v17  ;;  %928 = vmatpush2.msra.mxu0 %v161_v18  ;;  %v204_v61 = vld [vmem:[#allocation5 + $0x308] sm:$0xff]  ;;  %v139_v62 = vld [vmem:[#allocation5 + $0x100] sm:$0xff]  ;;  %v86_v2 = vld [vmem:[#allocation2 + $0x18] sm:$0xff] }
  0x6b   :  { %999 = vmatpush2.msra.mxu1 %v225_v19  ;;  %929 = vmatprep.subr.mxu0 %v160_v20  ;;  %v84_v63 = vld [vmem:[#allocation2 + $0x8] sm:$0xff]  ;;  %v203_v0 = vld [vmem:[#allocation5 + $0x300] sm:$0xff]  ;;  %v266_v3 = vld [vmem:[#allocation5 + $0x4f8] sm:$0xff] }
  0x6c   :  { %1000 = vmatprep.subr.mxu1 %v224_v21  ;;  %930 = vmatpush2.msra.mxu0 %v159_v22  ;;  %v83_v1 = vld [vmem:[#allocation2] sm:$0xff]  ;;  %v330_v4 = vld [vmem:[#allocation5 + $0x6f8] sm:$0xff]  ;;  %v85_v5 = vld [vmem:[#allocation2 + $0x10] sm:$0xff] }
  0x6d   :  { %1001 = vmatpush2.msra.mxu1 %v223_v23  ;;  %931 = vmatprep.subr.mxu0 %v158_v24  ;;  %v265_v6 = vld [vmem:[#allocation5 + $0x4f0] sm:$0xff]  ;;  %v264_v8 = vld [vmem:[#allocation5 + $0x4e8] sm:$0xff]  ;;  %v263_v10 = vld [vmem:[#allocation5 + $0x4e0] sm:$0xff] }
  0x6e   :  { %1002 = vmatprep.subr.mxu1 %v222_v25  ;;  %932 = vmatpush2.msra.mxu0 %v157_v26  ;;  %v329_v7 = vld [vmem:[#allocation5 + $0x6f0] sm:$0xff]  ;;  %v328_v9 = vld [vmem:[#allocation5 + $0x6e8] sm:$0xff]  ;;  %v327_v11 = vld [vmem:[#allocation5 + $0x6e0] sm:$0xff] }
  0x6f   :  { %1003 = vmatpush2.msra.mxu1 %v221_v27  ;;  %933 = vmatprep.subr.mxu0 %v156_v28  ;;  %v262_v12 = vld [vmem:[#allocation5 + $0x4d8] sm:$0xff]  ;;  %v261_v14 = vld [vmem:[#allocation5 + $0x4d0] sm:$0xff]  ;;  %v260_v16 = vld [vmem:[#allocation5 + $0x4c8] sm:$0xff] }
  0x70   :  { %1004 = vmatprep.subr.mxu1 %v220_v29  ;;  %934 = vmatpush2.msra.mxu0 %v155_v30  ;;  %v326_v13 = vld [vmem:[#allocation5 + $0x6d8] sm:$0xff]  ;;  %v325_v15 = vld [vmem:[#allocation5 + $0x6d0] sm:$0xff]  ;;  %v324_v17 = vld [vmem:[#allocation5 + $0x6c8] sm:$0xff] }
  0x71   :  { %1005 = vmatpush2.msra.mxu1 %v219_v31  ;;  %935 = vmatprep.subr.mxu0 %v154_v32  ;;  %v259_v18 = vld [vmem:[#allocation5 + $0x4c0] sm:$0xff]  ;;  %v258_v20 = vld [vmem:[#allocation5 + $0x4b8] sm:$0xff]  ;;  %v257_v22 = vld [vmem:[#allocation5 + $0x4b0] sm:$0xff] }
  0x72   :  { %1006 = vmatprep.subr.mxu1 %v218_v33  ;;  %936 = vmatpush2.msra.mxu0 %v153_v34  ;;  %v323_v19 = vld [vmem:[#allocation5 + $0x6c0] sm:$0xff]  ;;  %v322_v21 = vld [vmem:[#allocation5 + $0x6b8] sm:$0xff]  ;;  %v321_v23 = vld [vmem:[#allocation5 + $0x6b0] sm:$0xff] }
  0x73   :  { %1007 = vmatpush2.msra.mxu1 %v217_v35  ;;  %937 = vmatprep.subr.mxu0 %v152_v36  ;;  %v256_v24 = vld [vmem:[#allocation5 + $0x4a8] sm:$0xff]  ;;  %v255_v26 = vld [vmem:[#allocation5 + $0x4a0] sm:$0xff]  ;;  %v254_v28 = vld [vmem:[#allocation5 + $0x498] sm:$0xff] }
  0x74   :  { %1008 = vmatprep.subr.mxu1 %v216_v37  ;;  %938 = vmatpush2.msra.mxu0 %v151_v38  ;;  %v320_v25 = vld [vmem:[#allocation5 + $0x6a8] sm:$0xff]  ;;  %v319_v27 = vld [vmem:[#allocation5 + $0x6a0] sm:$0xff]  ;;  %v318_v29 = vld [vmem:[#allocation5 + $0x698] sm:$0xff] }
  0x75   :  { %1009 = vmatpush2.msra.mxu1 %v215_v39  ;;  %939 = vmatprep.subr.mxu0 %v150_v40  ;;  %v253_v30 = vld [vmem:[#allocation5 + $0x490] sm:$0xff]  ;;  %v252_v32 = vld [vmem:[#allocation5 + $0x488] sm:$0xff]  ;;  %v251_v34 = vld [vmem:[#allocation5 + $0x480] sm:$0xff] }
  0x76   :  { %1010 = vmatprep.subr.mxu1 %v214_v41  ;;  %940 = vmatpush2.msra.mxu0 %v149_v42  ;;  %v317_v31 = vld [vmem:[#allocation5 + $0x690] sm:$0xff]  ;;  %v316_v33 = vld [vmem:[#allocation5 + $0x688] sm:$0xff]  ;;  %v315_v35 = vld [vmem:[#allocation5 + $0x680] sm:$0xff] }
  0x77   :  { %1011 = vmatpush2.msra.mxu1 %v213_v43  ;;  %941 = vmatprep.subr.mxu0 %v148_v44  ;;  %v250_v36 = vld [vmem:[#allocation5 + $0x478] sm:$0xff]  ;;  %v249_v38 = vld [vmem:[#allocation5 + $0x470] sm:$0xff]  ;;  %v248_v40 = vld [vmem:[#allocation5 + $0x468] sm:$0xff] }
  0x78   :  { %1012 = vmatprep.subr.mxu1 %v212_v45  ;;  %942 = vmatpush2.msra.mxu0 %v147_v46  ;;  %v314_v37 = vld [vmem:[#allocation5 + $0x678] sm:$0xff]  ;;  %v313_v39 = vld [vmem:[#allocation5 + $0x670] sm:$0xff]  ;;  %v312_v41 = vld [vmem:[#allocation5 + $0x668] sm:$0xff] }
  0x79   :  { %1013 = vmatpush2.msra.mxu1 %v211_v47  ;;  %943 = vmatprep.subr.mxu0 %v146_v48  ;;  %v247_v42 = vld [vmem:[#allocation5 + $0x460] sm:$0xff]  ;;  %v246_v44 = vld [vmem:[#allocation5 + $0x458] sm:$0xff]  ;;  %v245_v46 = vld [vmem:[#allocation5 + $0x450] sm:$0xff] }
  0x7a   :  { %1014 = vmatprep.subr.mxu1 %v210_v49  ;;  %944 = vmatpush2.msra.mxu0 %v145_v50  ;;  %v311_v43 = vld [vmem:[#allocation5 + $0x660] sm:$0xff]  ;;  %v310_v45 = vld [vmem:[#allocation5 + $0x658] sm:$0xff]  ;;  %v309_v47 = vld [vmem:[#allocation5 + $0x650] sm:$0xff] }
  0x7b   :  { %1015 = vmatpush2.msra.mxu1 %v209_v51  ;;  %945 = vmatprep.subr.mxu0 %v144_v52  ;;  %v244_v48 = vld [vmem:[#allocation5 + $0x448] sm:$0xff]  ;;  %v243_v50 = vld [vmem:[#allocation5 + $0x440] sm:$0xff]  ;;  %v242_v52 = vld [vmem:[#allocation5 + $0x438] sm:$0xff] }
  0x7c   :  { %1016 = vmatprep.subr.mxu1 %v208_v53  ;;  %946 = vmatpush2.msra.mxu0 %v143_v54  ;;  %v308_v49 = vld [vmem:[#allocation5 + $0x648] sm:$0xff]  ;;  %v307_v51 = vld [vmem:[#allocation5 + $0x640] sm:$0xff]  ;;  %v306_v53 = vld [vmem:[#allocation5 + $0x638] sm:$0xff] }
  0x7d   :  { %1017 = vmatpush2.msra.mxu1 %v207_v55  ;;  %947 = vmatprep.subr.mxu0 %v142_v56  ;;  %v241_v54 = vld [vmem:[#allocation5 + $0x430] sm:$0xff]  ;;  %v240_v56 = vld [vmem:[#allocation5 + $0x428] sm:$0xff] }
  0x7e   :  { %1018 = vmatprep.subr.mxu1 %v206_v57  ;;  %948 = vmatpush2.msra.mxu0 %v141_v58  ;;  %v305_v55 = vld [vmem:[#allocation5 + $0x630] sm:$0xff]  ;;  %v304_v57 = vld [vmem:[#allocation5 + $0x628] sm:$0xff]  ;;  %v239_v58 = vld [vmem:[#allocation5 + $0x420] sm:$0xff] }
  0x7f   :  { %1019 = vmatpush2.msra.mxu1 %v205_v59  ;;  %949 = vmatprep.subr.mxu0 %v140_v60  ;;  %v303_v59 = vld [vmem:[#allocation5 + $0x620] sm:$0xff]  ;;  %v238_v60 = vld [vmem:[#allocation5 + $0x418] sm:$0xff] }
  0x80   :  { %1020 = vmatprep.subr.mxu1 %v204_v61  ;;  %950 = vmatpush2.msra.mxu0 %v139_v62  ;;  %v302_v61 = vld [vmem:[#allocation5 + $0x618] sm:$0xff]  ;;  %v237_v62 = vld [vmem:[#allocation5 + $0x410] sm:$0xff] }
  0x81   :  { %951 = vmatprep.mubr.f32.mxu0 %v84_v63  ;;  %1021 = vmatpush2.msra.mxu1 %v203_v0  ;;  %v301_v63 = vld [vmem:[#allocation5 + $0x610] sm:$0xff]  ;;  %v236_v0 = vld [vmem:[#allocation5 + $0x408] sm:$0xff] }
  0x82   :  { %952 = vmatmul.mubr.f32.vlgmr.msra.gmra.mxu0 %v83_v1  ;;  %1022 = vmatprep.mubr.f32.mxu1 %v86_v2  ;;  %v300_v1 = vld [vmem:[#allocation5 + $0x608] sm:$0xff]  ;;  %v235_v2 = vld [vmem:[#allocation5 + $0x400] sm:$0xff] }
  0x83   :  { %1029 = vmatprep.subr.mxu0 %v266_v3  ;;  %1100 = vmatprep.subr.mxu1 %v330_v4  ;;  %v299_v3 = vld [vmem:[#allocation5 + $0x600] sm:$0xff]  ;;  %v298_v4 = vld [vmem:[#allocation5 + $0x5f8] sm:$0xff] }
  0x84   :  { %1023 = vmatmul.mubr.f32.vlgmr.msra.gmra.mxu1 %v85_v5  ;;  %1030 = vmatpush1.msra.mxu0 %v265_v6  ;;  %v362_v5 = vld [vmem:[#allocation5 + $0x7f8] sm:$0xff]  ;;  %v297_v6 = vld [vmem:[#allocation5 + $0x5f0] sm:$0xff] }
  0x85   :  { %1101 = vmatpush1.msra.mxu1 %v329_v7  ;;  %1031 = vmatprep.subr.mxu0 %v264_v8  ;;  %v361_v7 = vld [vmem:[#allocation5 + $0x7f0] sm:$0xff]  ;;  %v296_v8 = vld [vmem:[#allocation5 + $0x5e8] sm:$0xff] }
  0x86   :  { %1102 = vmatprep.subr.mxu1 %v328_v9  ;;  %1032 = vmatpush1.msra.mxu0 %v263_v10  ;;  %v360_v9 = vld [vmem:[#allocation5 + $0x7e8] sm:$0xff]  ;;  %v295_v10 = vld [vmem:[#allocation5 + $0x5e0] sm:$0xff] }
  0x87   :  { %1103 = vmatpush1.msra.mxu1 %v327_v11  ;;  %1033 = vmatprep.subr.mxu0 %v262_v12  ;;  %v359_v11 = vld [vmem:[#allocation5 + $0x7e0] sm:$0xff]  ;;  %v294_v12 = vld [vmem:[#allocation5 + $0x5d8] sm:$0xff] }
  0x88   :  { %1104 = vmatprep.subr.mxu1 %v326_v13  ;;  %1034 = vmatpush1.msra.mxu0 %v261_v14  ;;  %v358_v13 = vld [vmem:[#allocation5 + $0x7d8] sm:$0xff]  ;;  %v293_v14 = vld [vmem:[#allocation5 + $0x5d0] sm:$0xff] }
  0x89   :  { %1105 = vmatpush1.msra.mxu1 %v325_v15  ;;  %1035 = vmatprep.subr.mxu0 %v260_v16  ;;  %v357_v15 = vld [vmem:[#allocation5 + $0x7d0] sm:$0xff]  ;;  %v292_v16 = vld [vmem:[#allocation5 + $0x5c8] sm:$0xff] }
  0x8a   :  { %1106 = vmatprep.subr.mxu1 %v324_v17  ;;  %1036 = vmatpush1.msra.mxu0 %v259_v18  ;;  %v356_v17 = vld [vmem:[#allocation5 + $0x7c8] sm:$0xff]  ;;  %v291_v18 = vld [vmem:[#allocation5 + $0x5c0] sm:$0xff] }
  0x8b   :  { %1107 = vmatpush1.msra.mxu1 %v323_v19  ;;  %1037 = vmatprep.subr.mxu0 %v258_v20  ;;  %v355_v19 = vld [vmem:[#allocation5 + $0x7c0] sm:$0xff]  ;;  %v290_v20 = vld [vmem:[#allocation5 + $0x5b8] sm:$0xff] }
  0x8c   :  { %1108 = vmatprep.subr.mxu1 %v322_v21  ;;  %1038 = vmatpush1.msra.mxu0 %v257_v22  ;;  %v354_v21 = vld [vmem:[#allocation5 + $0x7b8] sm:$0xff]  ;;  %v289_v22 = vld [vmem:[#allocation5 + $0x5b0] sm:$0xff] }
  0x8d   :  { %1109 = vmatpush1.msra.mxu1 %v321_v23  ;;  %1039 = vmatprep.subr.mxu0 %v256_v24  ;;  %v353_v23 = vld [vmem:[#allocation5 + $0x7b0] sm:$0xff]  ;;  %v288_v24 = vld [vmem:[#allocation5 + $0x5a8] sm:$0xff] }
  0x8e   :  { %1110 = vmatprep.subr.mxu1 %v320_v25  ;;  %1040 = vmatpush1.msra.mxu0 %v255_v26  ;;  %v352_v25 = vld [vmem:[#allocation5 + $0x7a8] sm:$0xff]  ;;  %v287_v26 = vld [vmem:[#allocation5 + $0x5a0] sm:$0xff] }
  0x8f   :  { %1111 = vmatpush1.msra.mxu1 %v319_v27  ;;  %1041 = vmatprep.subr.mxu0 %v254_v28  ;;  %v351_v27 = vld [vmem:[#allocation5 + $0x7a0] sm:$0xff]  ;;  %v286_v28 = vld [vmem:[#allocation5 + $0x598] sm:$0xff] }
  0x90   :  { %1112 = vmatprep.subr.mxu1 %v318_v29  ;;  %1042 = vmatpush1.msra.mxu0 %v253_v30  ;;  %v350_v29 = vld [vmem:[#allocation5 + $0x798] sm:$0xff]  ;;  %v285_v30 = vld [vmem:[#allocation5 + $0x590] sm:$0xff] }
  0x91   :  { %1113 = vmatpush1.msra.mxu1 %v317_v31  ;;  %1043 = vmatprep.subr.mxu0 %v252_v32  ;;  %v349_v31 = vld [vmem:[#allocation5 + $0x790] sm:$0xff]  ;;  %v284_v32 = vld [vmem:[#allocation5 + $0x588] sm:$0xff] }
  0x92   :  { %1114 = vmatprep.subr.mxu1 %v316_v33  ;;  %1044 = vmatpush1.msra.mxu0 %v251_v34  ;;  %v348_v33 = vld [vmem:[#allocation5 + $0x788] sm:$0xff]  ;;  %v283_v34 = vld [vmem:[#allocation5 + $0x580] sm:$0xff] }
  0x93   :  { %1115 = vmatpush1.msra.mxu1 %v315_v35  ;;  %1045 = vmatprep.subr.mxu0 %v250_v36  ;;  %v347_v35 = vld [vmem:[#allocation5 + $0x780] sm:$0xff]  ;;  %v282_v36 = vld [vmem:[#allocation5 + $0x578] sm:$0xff] }
  0x94   :  { %1116 = vmatprep.subr.mxu1 %v314_v37  ;;  %1046 = vmatpush1.msra.mxu0 %v249_v38  ;;  %v346_v37 = vld [vmem:[#allocation5 + $0x778] sm:$0xff]  ;;  %v281_v38 = vld [vmem:[#allocation5 + $0x570] sm:$0xff] }
  0x95   :  { %1117 = vmatpush1.msra.mxu1 %v313_v39  ;;  %1047 = vmatprep.subr.mxu0 %v248_v40  ;;  %v345_v39 = vld [vmem:[#allocation5 + $0x770] sm:$0xff]  ;;  %v280_v40 = vld [vmem:[#allocation5 + $0x568] sm:$0xff] }
  0x96   :  { %1118 = vmatprep.subr.mxu1 %v312_v41  ;;  %1048 = vmatpush1.msra.mxu0 %v247_v42  ;;  %v344_v41 = vld [vmem:[#allocation5 + $0x768] sm:$0xff]  ;;  %v279_v42 = vld [vmem:[#allocation5 + $0x560] sm:$0xff] }
  0x97   :  { %1119 = vmatpush1.msra.mxu1 %v311_v43  ;;  %1049 = vmatprep.subr.mxu0 %v246_v44  ;;  %v343_v43 = vld [vmem:[#allocation5 + $0x760] sm:$0xff]  ;;  %v278_v44 = vld [vmem:[#allocation5 + $0x558] sm:$0xff] }
  0x98   :  { %1120 = vmatprep.subr.mxu1 %v310_v45  ;;  %1050 = vmatpush1.msra.mxu0 %v245_v46  ;;  %v342_v45 = vld [vmem:[#allocation5 + $0x758] sm:$0xff]  ;;  %v277_v46 = vld [vmem:[#allocation5 + $0x550] sm:$0xff] }
  0x99   :  { %1121 = vmatpush1.msra.mxu1 %v309_v47  ;;  %1051 = vmatprep.subr.mxu0 %v244_v48  ;;  %v341_v47 = vld [vmem:[#allocation5 + $0x750] sm:$0xff]  ;;  %v276_v48 = vld [vmem:[#allocation5 + $0x548] sm:$0xff] }
  0x9a   :  { %1122 = vmatprep.subr.mxu1 %v308_v49  ;;  %1052 = vmatpush1.msra.mxu0 %v243_v50  ;;  %v340_v49 = vld [vmem:[#allocation5 + $0x748] sm:$0xff]  ;;  %v275_v50 = vld [vmem:[#allocation5 + $0x540] sm:$0xff] }
  0x9b   :  { %1123 = vmatpush1.msra.mxu1 %v307_v51  ;;  %1053 = vmatprep.subr.mxu0 %v242_v52  ;;  %v339_v51 = vld [vmem:[#allocation5 + $0x740] sm:$0xff]  ;;  %v274_v52 = vld [vmem:[#allocation5 + $0x538] sm:$0xff] }
  0x9c   :  { %1124 = vmatprep.subr.mxu1 %v306_v53  ;;  %1054 = vmatpush1.msra.mxu0 %v241_v54  ;;  %v338_v53 = vld [vmem:[#allocation5 + $0x738] sm:$0xff]  ;;  %v273_v54 = vld [vmem:[#allocation5 + $0x530] sm:$0xff] }
  0x9d   :  { %1125 = vmatpush1.msra.mxu1 %v305_v55  ;;  %1055 = vmatprep.subr.mxu0 %v240_v56  ;;  %v337_v55 = vld [vmem:[#allocation5 + $0x730] sm:$0xff]  ;;  %v272_v56 = vld [vmem:[#allocation5 + $0x528] sm:$0xff] }
  0x9e   :  { %1126 = vmatprep.subr.mxu1 %v304_v57  ;;  %1056 = vmatpush1.msra.mxu0 %v239_v58  ;;  %v336_v57 = vld [vmem:[#allocation5 + $0x728] sm:$0xff]  ;;  %v271_v58 = vld [vmem:[#allocation5 + $0x520] sm:$0xff] }
  0x9f   :  { %1127 = vmatpush1.msra.mxu1 %v303_v59  ;;  %1057 = vmatprep.subr.mxu0 %v238_v60  ;;  %v335_v59 = vld [vmem:[#allocation5 + $0x720] sm:$0xff]  ;;  %v270_v60 = vld [vmem:[#allocation5 + $0x518] sm:$0xff] }
  0xa0   :  { %1128 = vmatprep.subr.mxu1 %v302_v61  ;;  %1058 = vmatpush1.msra.mxu0 %v237_v62  ;;  %v334_v61 = vld [vmem:[#allocation5 + $0x718] sm:$0xff]  ;;  %v269_v62 = vld [vmem:[#allocation5 + $0x510] sm:$0xff] }
  0xa1   :  { %1129 = vmatpush1.msra.mxu1 %v301_v63  ;;  %1059 = vmatprep.subr.mxu0 %v236_v0  ;;  %v333_v63 = vld [vmem:[#allocation5 + $0x710] sm:$0xff]  ;;  %v268_v0 = vld [vmem:[#allocation5 + $0x508] sm:$0xff] }
  0xa2   :  { %1130 = vmatprep.subr.mxu1 %v300_v1  ;;  %1060 = vmatpush1.msra.mxu0 %v235_v2  ;;  %v332_v1 = vld [vmem:[#allocation5 + $0x708] sm:$0xff]  ;;  %v267_v2 = vld [vmem:[#allocation5 + $0x500] sm:$0xff] }
  0xa3   :  { %1131 = vmatpush1.msra.mxu1 %v299_v3  ;;  %1061 = vmatprep.subr.mxu0 %v298_v4  ;;  %v88_v3 = vld [vmem:[#allocation2 + $0x28] sm:$0xff]  ;;  %v331_v4 = vld [vmem:[#allocation5 + $0x700] sm:$0xff] }
  0xa4   :  { %1132 = vmatprep.subr.mxu1 %v362_v5  ;;  %1062 = vmatpush2.msra.mxu0 %v297_v6  ;;  %v87_v5 = vld [vmem:[#allocation2 + $0x20] sm:$0xff]  ;;  %v90_v6 = vld [vmem:[#allocation2 + $0x38] sm:$0xff] }
  0xa5   :  { %1133 = vmatpush2.msra.mxu1 %v361_v7  ;;  %1063 = vmatprep.subr.mxu0 %v296_v8  ;;  %v394_v7 = vld [vmem:[#allocation5 + $0x8f8] sm:$0xff] }
  0xa6   :  { %1134 = vmatprep.subr.mxu1 %v360_v9  ;;  %1064 = vmatpush2.msra.mxu0 %v295_v10  ;;  %v458_v8 = vld [vmem:[#allocation5 + $0xaf8] sm:$0xff]  ;;  %v89_v9 = vld [vmem:[#allocation2 + $0x30] sm:$0xff] }
  0xa7   :  { %1135 = vmatpush2.msra.mxu1 %v359_v11  ;;  %1065 = vmatprep.subr.mxu0 %v294_v12  ;;  %v393_v10 = vld [vmem:[#allocation5 + $0x8f0] sm:$0xff]  ;;  %v392_v12 = vld [vmem:[#allocation5 + $0x8e8] sm:$0xff] }
  0xa8   :  { %1136 = vmatprep.subr.mxu1 %v358_v13  ;;  %1066 = vmatpush2.msra.mxu0 %v293_v14  ;;  %v457_v11 = vld [vmem:[#allocation5 + $0xaf0] sm:$0xff]  ;;  %v456_v13 = vld [vmem:[#allocation5 + $0xae8] sm:$0xff]  ;;  %v391_v14 = vld [vmem:[#allocation5 + $0x8e0] sm:$0xff] }
  0xa9   :  { %1137 = vmatpush2.msra.mxu1 %v357_v15  ;;  %1067 = vmatprep.subr.mxu0 %v292_v16  ;;  %v455_v15 = vld [vmem:[#allocation5 + $0xae0] sm:$0xff]  ;;  %v390_v16 = vld [vmem:[#allocation5 + $0x8d8] sm:$0xff] }
  0xaa   :  { %1138 = vmatprep.subr.mxu1 %v356_v17  ;;  %1068 = vmatpush2.msra.mxu0 %v291_v18  ;;  %v454_v17 = vld [vmem:[#allocation5 + $0xad8] sm:$0xff]  ;;  %v389_v18 = vld [vmem:[#allocation5 + $0x8d0] sm:$0xff] }
  0xab   :  { %1139 = vmatpush2.msra.mxu1 %v355_v19  ;;  %1069 = vmatprep.subr.mxu0 %v290_v20  ;;  %v453_v19 = vld [vmem:[#allocation5 + $0xad0] sm:$0xff]  ;;  %v388_v20 = vld [vmem:[#allocation5 + $0x8c8] sm:$0xff] }
  0xac   :  { %1140 = vmatprep.subr.mxu1 %v354_v21  ;;  %1070 = vmatpush2.msra.mxu0 %v289_v22  ;;  %v452_v21 = vld [vmem:[#allocation5 + $0xac8] sm:$0xff]  ;;  %v387_v22 = vld [vmem:[#allocation5 + $0x8c0] sm:$0xff] }
  0xad   :  { %1141 = vmatpush2.msra.mxu1 %v353_v23  ;;  %1071 = vmatprep.subr.mxu0 %v288_v24  ;;  %v451_v23 = vld [vmem:[#allocation5 + $0xac0] sm:$0xff]  ;;  %v386_v24 = vld [vmem:[#allocation5 + $0x8b8] sm:$0xff] }
  0xae   :  { %1142 = vmatprep.subr.mxu1 %v352_v25  ;;  %1072 = vmatpush2.msra.mxu0 %v287_v26  ;;  %v450_v25 = vld [vmem:[#allocation5 + $0xab8] sm:$0xff]  ;;  %v385_v26 = vld [vmem:[#allocation5 + $0x8b0] sm:$0xff] }
  0xaf   :  { %1143 = vmatpush2.msra.mxu1 %v351_v27  ;;  %1073 = vmatprep.subr.mxu0 %v286_v28  ;;  %v449_v27 = vld [vmem:[#allocation5 + $0xab0] sm:$0xff]  ;;  %v384_v28 = vld [vmem:[#allocation5 + $0x8a8] sm:$0xff] }
  0xb0   :  { %1144 = vmatprep.subr.mxu1 %v350_v29  ;;  %1074 = vmatpush2.msra.mxu0 %v285_v30  ;;  %v448_v29 = vld [vmem:[#allocation5 + $0xaa8] sm:$0xff]  ;;  %v383_v30 = vld [vmem:[#allocation5 + $0x8a0] sm:$0xff] }
  0xb1   :  { %1145 = vmatpush2.msra.mxu1 %v349_v31  ;;  %1075 = vmatprep.subr.mxu0 %v284_v32  ;;  %v447_v31 = vld [vmem:[#allocation5 + $0xaa0] sm:$0xff]  ;;  %v382_v32 = vld [vmem:[#allocation5 + $0x898] sm:$0xff] }
  0xb2   :  { %1146 = vmatprep.subr.mxu1 %v348_v33  ;;  %1076 = vmatpush2.msra.mxu0 %v283_v34  ;;  %v446_v33 = vld [vmem:[#allocation5 + $0xa98] sm:$0xff]  ;;  %v381_v34 = vld [vmem:[#allocation5 + $0x890] sm:$0xff] }
  0xb3   :  { %1147 = vmatpush2.msra.mxu1 %v347_v35  ;;  %1077 = vmatprep.subr.mxu0 %v282_v36  ;;  %v445_v35 = vld [vmem:[#allocation5 + $0xa90] sm:$0xff]  ;;  %v380_v36 = vld [vmem:[#allocation5 + $0x888] sm:$0xff] }
  0xb4   :  { %1148 = vmatprep.subr.mxu1 %v346_v37  ;;  %1078 = vmatpush2.msra.mxu0 %v281_v38  ;;  %v444_v37 = vld [vmem:[#allocation5 + $0xa88] sm:$0xff]  ;;  %v379_v38 = vld [vmem:[#allocation5 + $0x880] sm:$0xff] }
  0xb5   :  { %1149 = vmatpush2.msra.mxu1 %v345_v39  ;;  %1079 = vmatprep.subr.mxu0 %v280_v40  ;;  %v443_v39 = vld [vmem:[#allocation5 + $0xa80] sm:$0xff]  ;;  %v378_v40 = vld [vmem:[#allocation5 + $0x878] sm:$0xff] }
  0xb6   :  { %1150 = vmatprep.subr.mxu1 %v344_v41  ;;  %1080 = vmatpush2.msra.mxu0 %v279_v42  ;;  %v442_v41 = vld [vmem:[#allocation5 + $0xa78] sm:$0xff]  ;;  %v377_v42 = vld [vmem:[#allocation5 + $0x870] sm:$0xff] }
  0xb7   :  { %1151 = vmatpush2.msra.mxu1 %v343_v43  ;;  %1081 = vmatprep.subr.mxu0 %v278_v44  ;;  %v441_v43 = vld [vmem:[#allocation5 + $0xa70] sm:$0xff]  ;;  %v376_v44 = vld [vmem:[#allocation5 + $0x868] sm:$0xff] }
  0xb8   :  { %1152 = vmatprep.subr.mxu1 %v342_v45  ;;  %1082 = vmatpush2.msra.mxu0 %v277_v46  ;;  %v440_v45 = vld [vmem:[#allocation5 + $0xa68] sm:$0xff]  ;;  %v375_v46 = vld [vmem:[#allocation5 + $0x860] sm:$0xff] }
  0xb9   :  { %1153 = vmatpush2.msra.mxu1 %v341_v47  ;;  %1083 = vmatprep.subr.mxu0 %v276_v48  ;;  %v439_v47 = vld [vmem:[#allocation5 + $0xa60] sm:$0xff]  ;;  %v374_v48 = vld [vmem:[#allocation5 + $0x858] sm:$0xff] }
  0xba   :  { %1154 = vmatprep.subr.mxu1 %v340_v49  ;;  %1084 = vmatpush2.msra.mxu0 %v275_v50  ;;  %v438_v49 = vld [vmem:[#allocation5 + $0xa58] sm:$0xff]  ;;  %v373_v50 = vld [vmem:[#allocation5 + $0x850] sm:$0xff] }
  0xbb   :  { %1155 = vmatpush2.msra.mxu1 %v339_v51  ;;  %1085 = vmatprep.subr.mxu0 %v274_v52  ;;  %v437_v51 = vld [vmem:[#allocation5 + $0xa50] sm:$0xff]  ;;  %v372_v52 = vld [vmem:[#allocation5 + $0x848] sm:$0xff] }
  0xbc   :  { %1156 = vmatprep.subr.mxu1 %v338_v53  ;;  %1086 = vmatpush2.msra.mxu0 %v273_v54  ;;  %v436_v53 = vld [vmem:[#allocation5 + $0xa48] sm:$0xff]  ;;  %v371_v54 = vld [vmem:[#allocation5 + $0x840] sm:$0xff] }
  0xbd   :  { %1157 = vmatpush2.msra.mxu1 %v337_v55  ;;  %1087 = vmatprep.subr.mxu0 %v272_v56  ;;  %v435_v55 = vld [vmem:[#allocation5 + $0xa40] sm:$0xff]  ;;  %v370_v56 = vld [vmem:[#allocation5 + $0x838] sm:$0xff] }
  0xbe   :  { %1158 = vmatprep.subr.mxu1 %v336_v57  ;;  %1088 = vmatpush2.msra.mxu0 %v271_v58  ;;  %v434_v57 = vld [vmem:[#allocation5 + $0xa38] sm:$0xff]  ;;  %v369_v58 = vld [vmem:[#allocation5 + $0x830] sm:$0xff] }
  0xbf   :  { %1159 = vmatpush2.msra.mxu1 %v335_v59  ;;  %1089 = vmatprep.subr.mxu0 %v270_v60  ;;  %v433_v59 = vld [vmem:[#allocation5 + $0xa30] sm:$0xff]  ;;  %v368_v60 = vld [vmem:[#allocation5 + $0x828] sm:$0xff] }
  0xc0   :  { %1160 = vmatprep.subr.mxu1 %v334_v61  ;;  %1090 = vmatpush2.msra.mxu0 %v269_v62  ;;  %v432_v61 = vld [vmem:[#allocation5 + $0xa28] sm:$0xff]  ;;  %v367_v62 = vld [vmem:[#allocation5 + $0x820] sm:$0xff] }
  0xc1   :  { %1161 = vmatpush2.msra.mxu1 %v333_v63  ;;  %1091 = vmatprep.subr.mxu0 %v268_v0  ;;  %v431_v63 = vld [vmem:[#allocation5 + $0xa20] sm:$0xff]  ;;  %v366_v0 = vld [vmem:[#allocation5 + $0x818] sm:$0xff] }
  0xc2   :  { %1162 = vmatprep.subr.mxu1 %v332_v1  ;;  %1092 = vmatpush2.msra.mxu0 %v267_v2  ;;  %v430_v1 = vld [vmem:[#allocation5 + $0xa18] sm:$0xff]  ;;  %v365_v2 = vld [vmem:[#allocation5 + $0x810] sm:$0xff] }
  0xc3   :  { %1093 = vmatprep.mubr.f32.mxu0 %v88_v3  ;;  %1163 = vmatpush2.msra.mxu1 %v331_v4  ;;  %v429_v3 = vld [vmem:[#allocation5 + $0xa10] sm:$0xff]  ;;  %v364_v4 = vld [vmem:[#allocation5 + $0x808] sm:$0xff] }
  0xc4   :  { %1094 = vmatmul.mubr.f32.vlgmr.msra.gmra.mxu0 %v87_v5  ;;  %1164 = vmatprep.mubr.f32.mxu1 %v90_v6  ;;  %v428_v5 = vld [vmem:[#allocation5 + $0xa08] sm:$0xff]  ;;  %v363_v6 = vld [vmem:[#allocation5 + $0x800] sm:$0xff] }
  0xc5   :  { %1171 = vmatprep.subr.mxu0 %v394_v7  ;;  %1242 = vmatprep.subr.mxu1 %v458_v8  ;;  %v427_v7 = vld [vmem:[#allocation5 + $0xa00] sm:$0xff]  ;;  %v426_v8 = vld [vmem:[#allocation5 + $0x9f8] sm:$0xff] }
  0xc6   :  { %1165 = vmatmul.mubr.f32.vlgmr.msra.gmra.mxu1 %v89_v9  ;;  %1172 = vmatpush1.msra.mxu0 %v393_v10  ;;  %v490_v9 = vld [vmem:[#allocation5 + $0xbf8] sm:$0xff]  ;;  %v425_v10 = vld [vmem:[#allocation5 + $0x9f0] sm:$0xff] }
  0xc7   :  { %1243 = vmatpush1.msra.mxu1 %v457_v11  ;;  %1173 = vmatprep.subr.mxu0 %v392_v12  ;;  %v489_v11 = vld [vmem:[#allocation5 + $0xbf0] sm:$0xff]  ;;  %v424_v12 = vld [vmem:[#allocation5 + $0x9e8] sm:$0xff] }
  0xc8   :  { %1244 = vmatprep.subr.mxu1 %v456_v13  ;;  %1174 = vmatpush1.msra.mxu0 %v391_v14  ;;  %v488_v13 = vld [vmem:[#allocation5 + $0xbe8] sm:$0xff]  ;;  %v423_v14 = vld [vmem:[#allocation5 + $0x9e0] sm:$0xff] }
  0xc9   :  { %1245 = vmatpush1.msra.mxu1 %v455_v15  ;;  %1175 = vmatprep.subr.mxu0 %v390_v16  ;;  %v487_v15 = vld [vmem:[#allocation5 + $0xbe0] sm:$0xff]  ;;  %v422_v16 = vld [vmem:[#allocation5 + $0x9d8] sm:$0xff] }
  0xca   :  { %1246 = vmatprep.subr.mxu1 %v454_v17  ;;  %1176 = vmatpush1.msra.mxu0 %v389_v18  ;;  %v486_v17 = vld [vmem:[#allocation5 + $0xbd8] sm:$0xff]  ;;  %v421_v18 = vld [vmem:[#allocation5 + $0x9d0] sm:$0xff] }
  0xcb   :  { %1247 = vmatpush1.msra.mxu1 %v453_v19  ;;  %1177 = vmatprep.subr.mxu0 %v388_v20  ;;  %v485_v19 = vld [vmem:[#allocation5 + $0xbd0] sm:$0xff]  ;;  %v420_v20 = vld [vmem:[#allocation5 + $0x9c8] sm:$0xff] }
  0xcc   :  { %1248 = vmatprep.subr.mxu1 %v452_v21  ;;  %1178 = vmatpush1.msra.mxu0 %v387_v22  ;;  %v484_v21 = vld [vmem:[#allocation5 + $0xbc8] sm:$0xff]  ;;  %v419_v22 = vld [vmem:[#allocation5 + $0x9c0] sm:$0xff] }
  0xcd   :  { %1249 = vmatpush1.msra.mxu1 %v451_v23  ;;  %1179 = vmatprep.subr.mxu0 %v386_v24  ;;  %v483_v23 = vld [vmem:[#allocation5 + $0xbc0] sm:$0xff]  ;;  %v418_v24 = vld [vmem:[#allocation5 + $0x9b8] sm:$0xff] }
  0xce   :  { %1250 = vmatprep.subr.mxu1 %v450_v25  ;;  %1180 = vmatpush1.msra.mxu0 %v385_v26  ;;  %v482_v25 = vld [vmem:[#allocation5 + $0xbb8] sm:$0xff]  ;;  %v417_v26 = vld [vmem:[#allocation5 + $0x9b0] sm:$0xff] }
  0xcf   :  { %1251 = vmatpush1.msra.mxu1 %v449_v27  ;;  %1181 = vmatprep.subr.mxu0 %v384_v28  ;;  %v481_v27 = vld [vmem:[#allocation5 + $0xbb0] sm:$0xff]  ;;  %v416_v28 = vld [vmem:[#allocation5 + $0x9a8] sm:$0xff] }
  0xd0   :  { %1252 = vmatprep.subr.mxu1 %v448_v29  ;;  %1182 = vmatpush1.msra.mxu0 %v383_v30  ;;  %v480_v29 = vld [vmem:[#allocation5 + $0xba8] sm:$0xff]  ;;  %v415_v30 = vld [vmem:[#allocation5 + $0x9a0] sm:$0xff] }
  0xd1   :  { %1253 = vmatpush1.msra.mxu1 %v447_v31  ;;  %1183 = vmatprep.subr.mxu0 %v382_v32  ;;  %v479_v31 = vld [vmem:[#allocation5 + $0xba0] sm:$0xff]  ;;  %v414_v32 = vld [vmem:[#allocation5 + $0x998] sm:$0xff] }
  0xd2   :  { %1254 = vmatprep.subr.mxu1 %v446_v33  ;;  %1184 = vmatpush1.msra.mxu0 %v381_v34  ;;  %v478_v33 = vld [vmem:[#allocation5 + $0xb98] sm:$0xff]  ;;  %v413_v34 = vld [vmem:[#allocation5 + $0x990] sm:$0xff] }
  0xd3   :  { %1255 = vmatpush1.msra.mxu1 %v445_v35  ;;  %1185 = vmatprep.subr.mxu0 %v380_v36  ;;  %v477_v35 = vld [vmem:[#allocation5 + $0xb90] sm:$0xff]  ;;  %v412_v36 = vld [vmem:[#allocation5 + $0x988] sm:$0xff] }
  0xd4   :  { %1256 = vmatprep.subr.mxu1 %v444_v37  ;;  %1186 = vmatpush1.msra.mxu0 %v379_v38  ;;  %v476_v37 = vld [vmem:[#allocation5 + $0xb88] sm:$0xff]  ;;  %v411_v38 = vld [vmem:[#allocation5 + $0x980] sm:$0xff] }
  0xd5   :  { %1257 = vmatpush1.msra.mxu1 %v443_v39  ;;  %1187 = vmatprep.subr.mxu0 %v378_v40  ;;  %v475_v39 = vld [vmem:[#allocation5 + $0xb80] sm:$0xff]  ;;  %v410_v40 = vld [vmem:[#allocation5 + $0x978] sm:$0xff] }
  0xd6   :  { %1258 = vmatprep.subr.mxu1 %v442_v41  ;;  %1188 = vmatpush1.msra.mxu0 %v377_v42  ;;  %v474_v41 = vld [vmem:[#allocation5 + $0xb78] sm:$0xff]  ;;  %v409_v42 = vld [vmem:[#allocation5 + $0x970] sm:$0xff] }
  0xd7   :  { %1259 = vmatpush1.msra.mxu1 %v441_v43  ;;  %1189 = vmatprep.subr.mxu0 %v376_v44  ;;  %v473_v43 = vld [vmem:[#allocation5 + $0xb70] sm:$0xff]  ;;  %v408_v44 = vld [vmem:[#allocation5 + $0x968] sm:$0xff] }
  0xd8   :  { %1260 = vmatprep.subr.mxu1 %v440_v45  ;;  %1190 = vmatpush1.msra.mxu0 %v375_v46  ;;  %v472_v45 = vld [vmem:[#allocation5 + $0xb68] sm:$0xff]  ;;  %v407_v46 = vld [vmem:[#allocation5 + $0x960] sm:$0xff] }
  0xd9   :  { %1261 = vmatpush1.msra.mxu1 %v439_v47  ;;  %1191 = vmatprep.subr.mxu0 %v374_v48  ;;  %v471_v47 = vld [vmem:[#allocation5 + $0xb60] sm:$0xff]  ;;  %v406_v48 = vld [vmem:[#allocation5 + $0x958] sm:$0xff] }
  0xda   :  { %1262 = vmatprep.subr.mxu1 %v438_v49  ;;  %1192 = vmatpush1.msra.mxu0 %v373_v50  ;;  %v470_v49 = vld [vmem:[#allocation5 + $0xb58] sm:$0xff]  ;;  %v405_v50 = vld [vmem:[#allocation5 + $0x950] sm:$0xff] }
  0xdb   :  { %1263 = vmatpush1.msra.mxu1 %v437_v51  ;;  %1193 = vmatprep.subr.mxu0 %v372_v52  ;;  %v469_v51 = vld [vmem:[#allocation5 + $0xb50] sm:$0xff]  ;;  %v404_v52 = vld [vmem:[#allocation5 + $0x948] sm:$0xff] }
  0xdc   :  { %1264 = vmatprep.subr.mxu1 %v436_v53  ;;  %1194 = vmatpush1.msra.mxu0 %v371_v54  ;;  %v468_v53 = vld [vmem:[#allocation5 + $0xb48] sm:$0xff]  ;;  %v403_v54 = vld [vmem:[#allocation5 + $0x940] sm:$0xff] }
  0xdd   :  { %1265 = vmatpush1.msra.mxu1 %v435_v55  ;;  %1195 = vmatprep.subr.mxu0 %v370_v56  ;;  %v467_v55 = vld [vmem:[#allocation5 + $0xb40] sm:$0xff]  ;;  %v402_v56 = vld [vmem:[#allocation5 + $0x938] sm:$0xff] }
  0xde   :  { %1266 = vmatprep.subr.mxu1 %v434_v57  ;;  %1196 = vmatpush1.msra.mxu0 %v369_v58  ;;  %v466_v57 = vld [vmem:[#allocation5 + $0xb38] sm:$0xff]  ;;  %v401_v58 = vld [vmem:[#allocation5 + $0x930] sm:$0xff] }
  0xdf   :  { %1267 = vmatpush1.msra.mxu1 %v433_v59  ;;  %1197 = vmatprep.subr.mxu0 %v368_v60  ;;  %v465_v59 = vld [vmem:[#allocation5 + $0xb30] sm:$0xff]  ;;  %v400_v60 = vld [vmem:[#allocation5 + $0x928] sm:$0xff] }
  0xe0   :  { %1268 = vmatprep.subr.mxu1 %v432_v61  ;;  %1198 = vmatpush1.msra.mxu0 %v367_v62  ;;  %v464_v61 = vld [vmem:[#allocation5 + $0xb28] sm:$0xff]  ;;  %v399_v62 = vld [vmem:[#allocation5 + $0x920] sm:$0xff] }
  0xe1   :  { %1269 = vmatpush1.msra.mxu1 %v431_v63  ;;  %1199 = vmatprep.subr.mxu0 %v366_v0  ;;  %v463_v63 = vld [vmem:[#allocation5 + $0xb20] sm:$0xff]  ;;  %v398_v0 = vld [vmem:[#allocation5 + $0x918] sm:$0xff] }
  0xe2   :  { %1270 = vmatprep.subr.mxu1 %v430_v1  ;;  %1200 = vmatpush1.msra.mxu0 %v365_v2  ;;  %v462_v1 = vld [vmem:[#allocation5 + $0xb18] sm:$0xff]  ;;  %v397_v2 = vld [vmem:[#allocation5 + $0x910] sm:$0xff] }
  0xe3   :  { %1271 = vmatpush1.msra.mxu1 %v429_v3  ;;  %1201 = vmatprep.subr.mxu0 %v364_v4  ;;  %v461_v3 = vld [vmem:[#allocation5 + $0xb10] sm:$0xff]  ;;  %v396_v4 = vld [vmem:[#allocation5 + $0x908] sm:$0xff] }
  0xe4   :  { %1272 = vmatprep.subr.mxu1 %v428_v5  ;;  %1202 = vmatpush1.msra.mxu0 %v363_v6  ;;  %v460_v5 = vld [vmem:[#allocation5 + $0xb08] sm:$0xff]  ;;  %v395_v6 = vld [vmem:[#allocation5 + $0x900] sm:$0xff] }
  0xe5   :  { %1273 = vmatpush1.msra.mxu1 %v427_v7  ;;  %1203 = vmatprep.subr.mxu0 %v426_v8  ;;  %v92_v7 = vld [vmem:[#allocation2 + $0x48] sm:$0xff]  ;;  %v459_v8 = vld [vmem:[#allocation5 + $0xb00] sm:$0xff] }
  0xe6   :  { %1274 = vmatprep.subr.mxu1 %v490_v9  ;;  %1204 = vmatpush2.msra.mxu0 %v425_v10  ;;  %v91_v9 = vld [vmem:[#allocation2 + $0x40] sm:$0xff]  ;;  %v94_v10 = vld [vmem:[#allocation2 + $0x58] sm:$0xff] }
  0xe7   :  { %1275 = vmatpush2.msra.mxu1 %v489_v11  ;;  %1205 = vmatprep.subr.mxu0 %v424_v12  ;;  %v522_v11 = vld [vmem:[#allocation5 + $0xcf8] sm:$0xff] }
  0xe8   :  { %1276 = vmatprep.subr.mxu1 %v488_v13  ;;  %1206 = vmatpush2.msra.mxu0 %v423_v14  ;;  %v586_v12 = vld [vmem:[#allocation5 + $0xef8] sm:$0xff]  ;;  %v93_v13 = vld [vmem:[#allocation2 + $0x50] sm:$0xff] }
  0xe9   :  { %1277 = vmatpush2.msra.mxu1 %v487_v15  ;;  %1207 = vmatprep.subr.mxu0 %v422_v16  ;;  %v521_v14 = vld [vmem:[#allocation5 + $0xcf0] sm:$0xff]  ;;  %v520_v16 = vld [vmem:[#allocation5 + $0xce8] sm:$0xff] }
  0xea   :  { %1278 = vmatprep.subr.mxu1 %v486_v17  ;;  %1208 = vmatpush2.msra.mxu0 %v421_v18  ;;  %v585_v15 = vld [vmem:[#allocation5 + $0xef0] sm:$0xff]  ;;  %v584_v17 = vld [vmem:[#allocation5 + $0xee8] sm:$0xff]  ;;  %v519_v18 = vld [vmem:[#allocation5 + $0xce0] sm:$0xff] }
  0xeb   :  { %1279 = vmatpush2.msra.mxu1 %v485_v19  ;;  %1209 = vmatprep.subr.mxu0 %v420_v20  ;;  %v583_v19 = vld [vmem:[#allocation5 + $0xee0] sm:$0xff]  ;;  %v518_v20 = vld [vmem:[#allocation5 + $0xcd8] sm:$0xff] }
  0xec   :  { %1280 = vmatprep.subr.mxu1 %v484_v21  ;;  %1210 = vmatpush2.msra.mxu0 %v419_v22  ;;  %v582_v21 = vld [vmem:[#allocation5 + $0xed8] sm:$0xff]  ;;  %v517_v22 = vld [vmem:[#allocation5 + $0xcd0] sm:$0xff] }
  0xed   :  { %1281 = vmatpush2.msra.mxu1 %v483_v23  ;;  %1211 = vmatprep.subr.mxu0 %v418_v24  ;;  %v581_v23 = vld [vmem:[#allocation5 + $0xed0] sm:$0xff]  ;;  %v516_v24 = vld [vmem:[#allocation5 + $0xcc8] sm:$0xff] }
  0xee   :  { %1282 = vmatprep.subr.mxu1 %v482_v25  ;;  %1212 = vmatpush2.msra.mxu0 %v417_v26  ;;  %v580_v25 = vld [vmem:[#allocation5 + $0xec8] sm:$0xff]  ;;  %v515_v26 = vld [vmem:[#allocation5 + $0xcc0] sm:$0xff] }
  0xef   :  { %1283 = vmatpush2.msra.mxu1 %v481_v27  ;;  %1213 = vmatprep.subr.mxu0 %v416_v28  ;;  %v579_v27 = vld [vmem:[#allocation5 + $0xec0] sm:$0xff]  ;;  %v514_v28 = vld [vmem:[#allocation5 + $0xcb8] sm:$0xff] }
  0xf0   :  { %1284 = vmatprep.subr.mxu1 %v480_v29  ;;  %1214 = vmatpush2.msra.mxu0 %v415_v30  ;;  %v578_v29 = vld [vmem:[#allocation5 + $0xeb8] sm:$0xff]  ;;  %v513_v30 = vld [vmem:[#allocation5 + $0xcb0] sm:$0xff] }
  0xf1   :  { %1285 = vmatpush2.msra.mxu1 %v479_v31  ;;  %1215 = vmatprep.subr.mxu0 %v414_v32  ;;  %v577_v31 = vld [vmem:[#allocation5 + $0xeb0] sm:$0xff]  ;;  %v512_v32 = vld [vmem:[#allocation5 + $0xca8] sm:$0xff] }
  0xf2   :  { %1286 = vmatprep.subr.mxu1 %v478_v33  ;;  %1216 = vmatpush2.msra.mxu0 %v413_v34  ;;  %v576_v33 = vld [vmem:[#allocation5 + $0xea8] sm:$0xff]  ;;  %v511_v34 = vld [vmem:[#allocation5 + $0xca0] sm:$0xff] }
  0xf3   :  { %1287 = vmatpush2.msra.mxu1 %v477_v35  ;;  %1217 = vmatprep.subr.mxu0 %v412_v36  ;;  %v575_v35 = vld [vmem:[#allocation5 + $0xea0] sm:$0xff]  ;;  %v510_v36 = vld [vmem:[#allocation5 + $0xc98] sm:$0xff] }
  0xf4   :  { %1288 = vmatprep.subr.mxu1 %v476_v37  ;;  %1218 = vmatpush2.msra.mxu0 %v411_v38  ;;  %v574_v37 = vld [vmem:[#allocation5 + $0xe98] sm:$0xff]  ;;  %v509_v38 = vld [vmem:[#allocation5 + $0xc90] sm:$0xff] }
  0xf5   :  { %1289 = vmatpush2.msra.mxu1 %v475_v39  ;;  %1219 = vmatprep.subr.mxu0 %v410_v40  ;;  %v573_v39 = vld [vmem:[#allocation5 + $0xe90] sm:$0xff]  ;;  %v508_v40 = vld [vmem:[#allocation5 + $0xc88] sm:$0xff] }
  0xf6   :  { %1290 = vmatprep.subr.mxu1 %v474_v41  ;;  %1220 = vmatpush2.msra.mxu0 %v409_v42  ;;  %v572_v41 = vld [vmem:[#allocation5 + $0xe88] sm:$0xff]  ;;  %v507_v42 = vld [vmem:[#allocation5 + $0xc80] sm:$0xff] }
  0xf7   :  { %1291 = vmatpush2.msra.mxu1 %v473_v43  ;;  %1221 = vmatprep.subr.mxu0 %v408_v44  ;;  %v571_v43 = vld [vmem:[#allocation5 + $0xe80] sm:$0xff]  ;;  %v506_v44 = vld [vmem:[#allocation5 + $0xc78] sm:$0xff] }
  0xf8   :  { %1292 = vmatprep.subr.mxu1 %v472_v45  ;;  %1222 = vmatpush2.msra.mxu0 %v407_v46  ;;  %v570_v45 = vld [vmem:[#allocation5 + $0xe78] sm:$0xff]  ;;  %v505_v46 = vld [vmem:[#allocation5 + $0xc70] sm:$0xff] }
  0xf9   :  { %1293 = vmatpush2.msra.mxu1 %v471_v47  ;;  %1223 = vmatprep.subr.mxu0 %v406_v48  ;;  %v569_v47 = vld [vmem:[#allocation5 + $0xe70] sm:$0xff]  ;;  %v504_v48 = vld [vmem:[#allocation5 + $0xc68] sm:$0xff] }
  0xfa   :  { %1294 = vmatprep.subr.mxu1 %v470_v49  ;;  %1224 = vmatpush2.msra.mxu0 %v405_v50  ;;  %v568_v49 = vld [vmem:[#allocation5 + $0xe68] sm:$0xff]  ;;  %v503_v50 = vld [vmem:[#allocation5 + $0xc60] sm:$0xff] }
  0xfb   :  { %1295 = vmatpush2.msra.mxu1 %v469_v51  ;;  %1225 = vmatprep.subr.mxu0 %v404_v52  ;;  %v567_v51 = vld [vmem:[#allocation5 + $0xe60] sm:$0xff]  ;;  %v502_v52 = vld [vmem:[#allocation5 + $0xc58] sm:$0xff] }
  0xfc   :  { %1296 = vmatprep.subr.mxu1 %v468_v53  ;;  %1226 = vmatpush2.msra.mxu0 %v403_v54  ;;  %v566_v53 = vld [vmem:[#allocation5 + $0xe58] sm:$0xff]  ;;  %v501_v54 = vld [vmem:[#allocation5 + $0xc50] sm:$0xff] }
  0xfd   :  { %1297 = vmatpush2.msra.mxu1 %v467_v55  ;;  %1227 = vmatprep.subr.mxu0 %v402_v56  ;;  %v565_v55 = vld [vmem:[#allocation5 + $0xe50] sm:$0xff]  ;;  %v500_v56 = vld [vmem:[#allocation5 + $0xc48] sm:$0xff] }
  0xfe   :  { %1298 = vmatprep.subr.mxu1 %v466_v57  ;;  %1228 = vmatpush2.msra.mxu0 %v401_v58  ;;  %v564_v57 = vld [vmem:[#allocation5 + $0xe48] sm:$0xff]  ;;  %v499_v58 = vld [vmem:[#allocation5 + $0xc40] sm:$0xff] }
  0xff   :  { %1299 = vmatpush2.msra.mxu1 %v465_v59  ;;  %1229 = vmatprep.subr.mxu0 %v400_v60  ;;  %v563_v59 = vld [vmem:[#allocation5 + $0xe40] sm:$0xff]  ;;  %v498_v60 = vld [vmem:[#allocation5 + $0xc38] sm:$0xff] }
 0x100   :  { %1300 = vmatprep.subr.mxu1 %v464_v61  ;;  %1230 = vmatpush2.msra.mxu0 %v399_v62  ;;  %v562_v61 = vld [vmem:[#allocation5 + $0xe38] sm:$0xff]  ;;  %v497_v62 = vld [vmem:[#allocation5 + $0xc30] sm:$0xff] }
 0x101   :  { %1301 = vmatpush2.msra.mxu1 %v463_v63  ;;  %1231 = vmatprep.subr.mxu0 %v398_v0  ;;  %v561_v63 = vld [vmem:[#allocation5 + $0xe30] sm:$0xff]  ;;  %v496_v0 = vld [vmem:[#allocation5 + $0xc28] sm:$0xff] }
 0x102   :  { %1302 = vmatprep.subr.mxu1 %v462_v1  ;;  %1232 = vmatpush2.msra.mxu0 %v397_v2  ;;  %v560_v1 = vld [vmem:[#allocation5 + $0xe28] sm:$0xff]  ;;  %v495_v2 = vld [vmem:[#allocation5 + $0xc20] sm:$0xff] }
 0x103   :  { %1303 = vmatpush2.msra.mxu1 %v461_v3  ;;  %1233 = vmatprep.subr.mxu0 %v396_v4  ;;  %v559_v3 = vld [vmem:[#allocation5 + $0xe20] sm:$0xff]  ;;  %v494_v4 = vld [vmem:[#allocation5 + $0xc18] sm:$0xff] }
 0x104   :  { %1304 = vmatprep.subr.mxu1 %v460_v5  ;;  %1234 = vmatpush2.msra.mxu0 %v395_v6  ;;  %v558_v5 = vld [vmem:[#allocation5 + $0xe18] sm:$0xff]  ;;  %v493_v6 = vld [vmem:[#allocation5 + $0xc10] sm:$0xff] }
 0x105   :  { %1235 = vmatprep.mubr.f32.mxu0 %v92_v7  ;;  %1305 = vmatpush2.msra.mxu1 %v459_v8  ;;  %v557_v7 = vld [vmem:[#allocation5 + $0xe10] sm:$0xff]  ;;  %v492_v8 = vld [vmem:[#allocation5 + $0xc08] sm:$0xff] }
 0x106   :  { %1236 = vmatmul.mubr.f32.vlgmr.msra.gmra.mxu0 %v91_v9  ;;  %1306 = vmatprep.mubr.f32.mxu1 %v94_v10  ;;  %v556_v9 = vld [vmem:[#allocation5 + $0xe08] sm:$0xff]  ;;  %v491_v10 = vld [vmem:[#allocation5 + $0xc00] sm:$0xff] }
 0x107   :  { %1313 = vmatprep.subr.mxu0 %v522_v11  ;;  %1384 = vmatprep.subr.mxu1 %v586_v12  ;;  %v555_v11 = vld [vmem:[#allocation5 + $0xe00] sm:$0xff]  ;;  %v554_v12 = vld [vmem:[#allocation5 + $0xdf8] sm:$0xff] }
 0x108   :  { %1307 = vmatmul.mubr.f32.vlgmr.msra.gmra.mxu1 %v93_v13  ;;  %1314 = vmatpush1.msra.mxu0 %v521_v14  ;;  %v618_v13 = vld [vmem:[#allocation5 + $0xff8] sm:$0xff]  ;;  %v553_v14 = vld [vmem:[#allocation5 + $0xdf0] sm:$0xff] }
 0x109   :  { %1385 = vmatpush1.msra.mxu1 %v585_v15  ;;  %1315 = vmatprep.subr.mxu0 %v520_v16  ;;  %v617_v15 = vld [vmem:[#allocation5 + $0xff0] sm:$0xff]  ;;  %v552_v16 = vld [vmem:[#allocation5 + $0xde8] sm:$0xff] }
 0x10a   :  { %1386 = vmatprep.subr.mxu1 %v584_v17  ;;  %1316 = vmatpush1.msra.mxu0 %v519_v18  ;;  %v616_v17 = vld [vmem:[#allocation5 + $0xfe8] sm:$0xff]  ;;  %v551_v18 = vld [vmem:[#allocation5 + $0xde0] sm:$0xff] }
 0x10b   :  { %1387 = vmatpush1.msra.mxu1 %v583_v19  ;;  %1317 = vmatprep.subr.mxu0 %v518_v20  ;;  %v615_v19 = vld [vmem:[#allocation5 + $0xfe0] sm:$0xff]  ;;  %v550_v20 = vld [vmem:[#allocation5 + $0xdd8] sm:$0xff] }
 0x10c   :  { %1388 = vmatprep.subr.mxu1 %v582_v21  ;;  %1318 = vmatpush1.msra.mxu0 %v517_v22  ;;  %v614_v21 = vld [vmem:[#allocation5 + $0xfd8] sm:$0xff]  ;;  %v549_v22 = vld [vmem:[#allocation5 + $0xdd0] sm:$0xff] }
 0x10d   :  { %1389 = vmatpush1.msra.mxu1 %v581_v23  ;;  %1319 = vmatprep.subr.mxu0 %v516_v24  ;;  %v613_v23 = vld [vmem:[#allocation5 + $0xfd0] sm:$0xff]  ;;  %v548_v24 = vld [vmem:[#allocation5 + $0xdc8] sm:$0xff] }
 0x10e   :  { %1390 = vmatprep.subr.mxu1 %v580_v25  ;;  %1320 = vmatpush1.msra.mxu0 %v515_v26  ;;  %v612_v25 = vld [vmem:[#allocation5 + $0xfc8] sm:$0xff]  ;;  %v547_v26 = vld [vmem:[#allocation5 + $0xdc0] sm:$0xff] }
 0x10f   :  { %1391 = vmatpush1.msra.mxu1 %v579_v27  ;;  %1321 = vmatprep.subr.mxu0 %v514_v28  ;;  %v611_v27 = vld [vmem:[#allocation5 + $0xfc0] sm:$0xff]  ;;  %v546_v28 = vld [vmem:[#allocation5 + $0xdb8] sm:$0xff] }
 0x110   :  { %1392 = vmatprep.subr.mxu1 %v578_v29  ;;  %1322 = vmatpush1.msra.mxu0 %v513_v30  ;;  %v610_v29 = vld [vmem:[#allocation5 + $0xfb8] sm:$0xff]  ;;  %v545_v30 = vld [vmem:[#allocation5 + $0xdb0] sm:$0xff] }
 0x111   :  { %1393 = vmatpush1.msra.mxu1 %v577_v31  ;;  %1323 = vmatprep.subr.mxu0 %v512_v32  ;;  %v609_v31 = vld [vmem:[#allocation5 + $0xfb0] sm:$0xff]  ;;  %v544_v32 = vld [vmem:[#allocation5 + $0xda8] sm:$0xff] }
 0x112   :  { %1394 = vmatprep.subr.mxu1 %v576_v33  ;;  %1324 = vmatpush1.msra.mxu0 %v511_v34  ;;  %v608_v33 = vld [vmem:[#allocation5 + $0xfa8] sm:$0xff]  ;;  %v543_v34 = vld [vmem:[#allocation5 + $0xda0] sm:$0xff] }
 0x113   :  { %1395 = vmatpush1.msra.mxu1 %v575_v35  ;;  %1325 = vmatprep.subr.mxu0 %v510_v36  ;;  %v607_v35 = vld [vmem:[#allocation5 + $0xfa0] sm:$0xff]  ;;  %v542_v36 = vld [vmem:[#allocation5 + $0xd98] sm:$0xff] }
 0x114   :  { %1396 = vmatprep.subr.mxu1 %v574_v37  ;;  %1326 = vmatpush1.msra.mxu0 %v509_v38  ;;  %v606_v37 = vld [vmem:[#allocation5 + $0xf98] sm:$0xff]  ;;  %v541_v38 = vld [vmem:[#allocation5 + $0xd90] sm:$0xff] }
 0x115   :  { %1397 = vmatpush1.msra.mxu1 %v573_v39  ;;  %1327 = vmatprep.subr.mxu0 %v508_v40  ;;  %v605_v39 = vld [vmem:[#allocation5 + $0xf90] sm:$0xff]  ;;  %v540_v40 = vld [vmem:[#allocation5 + $0xd88] sm:$0xff] }
 0x116   :  { %1398 = vmatprep.subr.mxu1 %v572_v41  ;;  %1328 = vmatpush1.msra.mxu0 %v507_v42  ;;  %v604_v41 = vld [vmem:[#allocation5 + $0xf88] sm:$0xff]  ;;  %v539_v42 = vld [vmem:[#allocation5 + $0xd80] sm:$0xff] }
 0x117   :  { %1399 = vmatpush1.msra.mxu1 %v571_v43  ;;  %1329 = vmatprep.subr.mxu0 %v506_v44  ;;  %v603_v43 = vld [vmem:[#allocation5 + $0xf80] sm:$0xff]  ;;  %v538_v44 = vld [vmem:[#allocation5 + $0xd78] sm:$0xff] }
 0x118   :  { %1400 = vmatprep.subr.mxu1 %v570_v45  ;;  %1330 = vmatpush1.msra.mxu0 %v505_v46  ;;  %v602_v45 = vld [vmem:[#allocation5 + $0xf78] sm:$0xff]  ;;  %v537_v46 = vld [vmem:[#allocation5 + $0xd70] sm:$0xff] }
 0x119   :  { %1401 = vmatpush1.msra.mxu1 %v569_v47  ;;  %1331 = vmatprep.subr.mxu0 %v504_v48  ;;  %v601_v47 = vld [vmem:[#allocation5 + $0xf70] sm:$0xff]  ;;  %v536_v48 = vld [vmem:[#allocation5 + $0xd68] sm:$0xff] }
 0x11a   :  { %1402 = vmatprep.subr.mxu1 %v568_v49  ;;  %1332 = vmatpush1.msra.mxu0 %v503_v50  ;;  %v600_v49 = vld [vmem:[#allocation5 + $0xf68] sm:$0xff]  ;;  %v535_v50 = vld [vmem:[#allocation5 + $0xd60] sm:$0xff] }
 0x11b   :  { %1403 = vmatpush1.msra.mxu1 %v567_v51  ;;  %1333 = vmatprep.subr.mxu0 %v502_v52  ;;  %v599_v51 = vld [vmem:[#allocation5 + $0xf60] sm:$0xff]  ;;  %v534_v52 = vld [vmem:[#allocation5 + $0xd58] sm:$0xff] }
 0x11c   :  { %1404 = vmatprep.subr.mxu1 %v566_v53  ;;  %1334 = vmatpush1.msra.mxu0 %v501_v54  ;;  %v598_v53 = vld [vmem:[#allocation5 + $0xf58] sm:$0xff]  ;;  %v533_v54 = vld [vmem:[#allocation5 + $0xd50] sm:$0xff] }
 0x11d   :  { %1405 = vmatpush1.msra.mxu1 %v565_v55  ;;  %1335 = vmatprep.subr.mxu0 %v500_v56  ;;  %v597_v55 = vld [vmem:[#allocation5 + $0xf50] sm:$0xff]  ;;  %v532_v56 = vld [vmem:[#allocation5 + $0xd48] sm:$0xff] }
 0x11e   :  { %1406 = vmatprep.subr.mxu1 %v564_v57  ;;  %1336 = vmatpush1.msra.mxu0 %v499_v58  ;;  %v596_v57 = vld [vmem:[#allocation5 + $0xf48] sm:$0xff]  ;;  %v531_v58 = vld [vmem:[#allocation5 + $0xd40] sm:$0xff] }
 0x11f   :  { %1407 = vmatpush1.msra.mxu1 %v563_v59  ;;  %1337 = vmatprep.subr.mxu0 %v498_v60  ;;  %v595_v59 = vld [vmem:[#allocation5 + $0xf40] sm:$0xff]  ;;  %v530_v60 = vld [vmem:[#allocation5 + $0xd38] sm:$0xff] }
 0x120   :  { %1408 = vmatprep.subr.mxu1 %v562_v61  ;;  %1338 = vmatpush1.msra.mxu0 %v497_v62  ;;  %v594_v61 = vld [vmem:[#allocation5 + $0xf38] sm:$0xff]  ;;  %v529_v62 = vld [vmem:[#allocation5 + $0xd30] sm:$0xff] }
 0x121   :  { %1409 = vmatpush1.msra.mxu1 %v561_v63  ;;  %1339 = vmatprep.subr.mxu0 %v496_v0  ;;  %v593_v63 = vld [vmem:[#allocation5 + $0xf30] sm:$0xff]  ;;  %v528_v0 = vld [vmem:[#allocation5 + $0xd28] sm:$0xff] }
 0x122   :  { %1410 = vmatprep.subr.mxu1 %v560_v1  ;;  %1340 = vmatpush1.msra.mxu0 %v495_v2  ;;  %v592_v1 = vld [vmem:[#allocation5 + $0xf28] sm:$0xff]  ;;  %v527_v2 = vld [vmem:[#allocation5 + $0xd20] sm:$0xff] }
 0x123   :  { %1411 = vmatpush1.msra.mxu1 %v559_v3  ;;  %1341 = vmatprep.subr.mxu0 %v494_v4  ;;  %v591_v3 = vld [vmem:[#allocation5 + $0xf20] sm:$0xff]  ;;  %v526_v4 = vld [vmem:[#allocation5 + $0xd18] sm:$0xff] }
 0x124   :  { %1412 = vmatprep.subr.mxu1 %v558_v5  ;;  %1342 = vmatpush1.msra.mxu0 %v493_v6  ;;  %v590_v5 = vld [vmem:[#allocation5 + $0xf18] sm:$0xff]  ;;  %v525_v6 = vld [vmem:[#allocation5 + $0xd10] sm:$0xff] }
 0x125   :  { %1413 = vmatpush1.msra.mxu1 %v557_v7  ;;  %1343 = vmatprep.subr.mxu0 %v492_v8  ;;  %v589_v7 = vld [vmem:[#allocation5 + $0xf10] sm:$0xff]  ;;  %v524_v8 = vld [vmem:[#allocation5 + $0xd08] sm:$0xff] }
 0x126   :  { %1414 = vmatprep.subr.mxu1 %v556_v9  ;;  %1344 = vmatpush1.msra.mxu0 %v491_v10  ;;  %v588_v9 = vld [vmem:[#allocation5 + $0xf08] sm:$0xff]  ;;  %v523_v10 = vld [vmem:[#allocation5 + $0xd00] sm:$0xff] }
 0x127   :  { %1415 = vmatpush1.msra.mxu1 %v555_v11  ;;  %1345 = vmatprep.subr.mxu0 %v554_v12  ;;  %v96_v11 = vld [vmem:[#allocation2 + $0x68] sm:$0xff]  ;;  %v587_v12 = vld [vmem:[#allocation5 + $0xf00] sm:$0xff] }
 0x128   :  { %1416 = vmatprep.subr.mxu1 %v618_v13  ;;  %1346 = vmatpush2.msra.mxu0 %v553_v14  ;;  %v95_v13 = vld [vmem:[#allocation2 + $0x60] sm:$0xff]  ;;  %v98_v14 = vld [vmem:[#allocation2 + $0x78] sm:$0xff] }
 0x129   :  { %1417 = vmatpush2.msra.mxu1 %v617_v15  ;;  %1347 = vmatprep.subr.mxu0 %v552_v16  ;;  %v650_v15 = vld [vmem:[#allocation5 + $0x10f8] sm:$0xff] }
 0x12a   :  { %1418 = vmatprep.subr.mxu1 %v616_v17  ;;  %1348 = vmatpush2.msra.mxu0 %v551_v18  ;;  %v714_v16 = vld [vmem:[#allocation5 + $0x12f8] sm:$0xff]  ;;  %v97_v17 = vld [vmem:[#allocation2 + $0x70] sm:$0xff] }
 0x12b   :  { %1419 = vmatpush2.msra.mxu1 %v615_v19  ;;  %1349 = vmatprep.subr.mxu0 %v550_v20  ;;  %v649_v18 = vld [vmem:[#allocation5 + $0x10f0] sm:$0xff]  ;;  %v648_v20 = vld [vmem:[#allocation5 + $0x10e8] sm:$0xff] }
 0x12c   :  { %1420 = vmatprep.subr.mxu1 %v614_v21  ;;  %1350 = vmatpush2.msra.mxu0 %v549_v22  ;;  %v713_v19 = vld [vmem:[#allocation5 + $0x12f0] sm:$0xff]  ;;  %v712_v21 = vld [vmem:[#allocation5 + $0x12e8] sm:$0xff]  ;;  %v647_v22 = vld [vmem:[#allocation5 + $0x10e0] sm:$0xff] }
 0x12d   :  { %1421 = vmatpush2.msra.mxu1 %v613_v23  ;;  %1351 = vmatprep.subr.mxu0 %v548_v24  ;;  %v711_v23 = vld [vmem:[#allocation5 + $0x12e0] sm:$0xff]  ;;  %v646_v24 = vld [vmem:[#allocation5 + $0x10d8] sm:$0xff] }
 0x12e   :  { %1422 = vmatprep.subr.mxu1 %v612_v25  ;;  %1352 = vmatpush2.msra.mxu0 %v547_v26  ;;  %v710_v25 = vld [vmem:[#allocation5 + $0x12d8] sm:$0xff]  ;;  %v645_v26 = vld [vmem:[#allocation5 + $0x10d0] sm:$0xff] }
 0x12f   :  { %1423 = vmatpush2.msra.mxu1 %v611_v27  ;;  %1353 = vmatprep.subr.mxu0 %v546_v28  ;;  %v709_v27 = vld [vmem:[#allocation5 + $0x12d0] sm:$0xff]  ;;  %v644_v28 = vld [vmem:[#allocation5 + $0x10c8] sm:$0xff] }
 0x130   :  { %1424 = vmatprep.subr.mxu1 %v610_v29  ;;  %1354 = vmatpush2.msra.mxu0 %v545_v30  ;;  %v708_v29 = vld [vmem:[#allocation5 + $0x12c8] sm:$0xff]  ;;  %v643_v30 = vld [vmem:[#allocation5 + $0x10c0] sm:$0xff] }
 0x131   :  { %1425 = vmatpush2.msra.mxu1 %v609_v31  ;;  %1355 = vmatprep.subr.mxu0 %v544_v32  ;;  %v707_v31 = vld [vmem:[#allocation5 + $0x12c0] sm:$0xff]  ;;  %v642_v32 = vld [vmem:[#allocation5 + $0x10b8] sm:$0xff] }
 0x132   :  { %1426 = vmatprep.subr.mxu1 %v608_v33  ;;  %1356 = vmatpush2.msra.mxu0 %v543_v34  ;;  %v706_v33 = vld [vmem:[#allocation5 + $0x12b8] sm:$0xff]  ;;  %v641_v34 = vld [vmem:[#allocation5 + $0x10b0] sm:$0xff] }
 0x133   :  { %1427 = vmatpush2.msra.mxu1 %v607_v35  ;;  %1357 = vmatprep.subr.mxu0 %v542_v36  ;;  %v705_v35 = vld [vmem:[#allocation5 + $0x12b0] sm:$0xff]  ;;  %v640_v36 = vld [vmem:[#allocation5 + $0x10a8] sm:$0xff] }
 0x134   :  { %1428 = vmatprep.subr.mxu1 %v606_v37  ;;  %1358 = vmatpush2.msra.mxu0 %v541_v38  ;;  %v704_v37 = vld [vmem:[#allocation5 + $0x12a8] sm:$0xff]  ;;  %v639_v38 = vld [vmem:[#allocation5 + $0x10a0] sm:$0xff] }
 0x135   :  { %1429 = vmatpush2.msra.mxu1 %v605_v39  ;;  %1359 = vmatprep.subr.mxu0 %v540_v40  ;;  %v703_v39 = vld [vmem:[#allocation5 + $0x12a0] sm:$0xff]  ;;  %v638_v40 = vld [vmem:[#allocation5 + $0x1098] sm:$0xff] }
 0x136   :  { %1430 = vmatprep.subr.mxu1 %v604_v41  ;;  %1360 = vmatpush2.msra.mxu0 %v539_v42  ;;  %v702_v41 = vld [vmem:[#allocation5 + $0x1298] sm:$0xff]  ;;  %v637_v42 = vld [vmem:[#allocation5 + $0x1090] sm:$0xff] }
 0x137   :  { %1431 = vmatpush2.msra.mxu1 %v603_v43  ;;  %1361 = vmatprep.subr.mxu0 %v538_v44  ;;  %v701_v43 = vld [vmem:[#allocation5 + $0x1290] sm:$0xff]  ;;  %v636_v44 = vld [vmem:[#allocation5 + $0x1088] sm:$0xff] }
 0x138   :  { %1432 = vmatprep.subr.mxu1 %v602_v45  ;;  %1362 = vmatpush2.msra.mxu0 %v537_v46  ;;  %v700_v45 = vld [vmem:[#allocation5 + $0x1288] sm:$0xff]  ;;  %v635_v46 = vld [vmem:[#allocation5 + $0x1080] sm:$0xff] }
 0x139   :  { %1433 = vmatpush2.msra.mxu1 %v601_v47  ;;  %1363 = vmatprep.subr.mxu0 %v536_v48  ;;  %v699_v47 = vld [vmem:[#allocation5 + $0x1280] sm:$0xff]  ;;  %v634_v48 = vld [vmem:[#allocation5 + $0x1078] sm:$0xff] }
 0x13a   :  { %1434 = vmatprep.subr.mxu1 %v600_v49  ;;  %1364 = vmatpush2.msra.mxu0 %v535_v50  ;;  %v698_v49 = vld [vmem:[#allocation5 + $0x1278] sm:$0xff]  ;;  %v633_v50 = vld [vmem:[#allocation5 + $0x1070] sm:$0xff] }
 0x13b   :  { %1435 = vmatpush2.msra.mxu1 %v599_v51  ;;  %1365 = vmatprep.subr.mxu0 %v534_v52  ;;  %v697_v51 = vld [vmem:[#allocation5 + $0x1270] sm:$0xff]  ;;  %v632_v52 = vld [vmem:[#allocation5 + $0x1068] sm:$0xff] }
 0x13c   :  { %1436 = vmatprep.subr.mxu1 %v598_v53  ;;  %1366 = vmatpush2.msra.mxu0 %v533_v54  ;;  %v696_v53 = vld [vmem:[#allocation5 + $0x1268] sm:$0xff]  ;;  %v631_v54 = vld [vmem:[#allocation5 + $0x1060] sm:$0xff] }
 0x13d   :  { %1437 = vmatpush2.msra.mxu1 %v597_v55  ;;  %1367 = vmatprep.subr.mxu0 %v532_v56  ;;  %v695_v55 = vld [vmem:[#allocation5 + $0x1260] sm:$0xff]  ;;  %v630_v56 = vld [vmem:[#allocation5 + $0x1058] sm:$0xff] }
 0x13e   :  { %1438 = vmatprep.subr.mxu1 %v596_v57  ;;  %1368 = vmatpush2.msra.mxu0 %v531_v58  ;;  %v694_v57 = vld [vmem:[#allocation5 + $0x1258] sm:$0xff]  ;;  %v629_v58 = vld [vmem:[#allocation5 + $0x1050] sm:$0xff] }
 0x13f   :  { %1439 = vmatpush2.msra.mxu1 %v595_v59  ;;  %1369 = vmatprep.subr.mxu0 %v530_v60  ;;  %v693_v59 = vld [vmem:[#allocation5 + $0x1250] sm:$0xff]  ;;  %v628_v60 = vld [vmem:[#allocation5 + $0x1048] sm:$0xff] }
 0x140   :  { %1440 = vmatprep.subr.mxu1 %v594_v61  ;;  %1370 = vmatpush2.msra.mxu0 %v529_v62  ;;  %v692_v61 = vld [vmem:[#allocation5 + $0x1248] sm:$0xff]  ;;  %v627_v62 = vld [vmem:[#allocation5 + $0x1040] sm:$0xff] }
 0x141   :  { %1441 = vmatpush2.msra.mxu1 %v593_v63  ;;  %1371 = vmatprep.subr.mxu0 %v528_v0  ;;  %v691_v63 = vld [vmem:[#allocation5 + $0x1240] sm:$0xff]  ;;  %v626_v0 = vld [vmem:[#allocation5 + $0x1038] sm:$0xff] }
 0x142   :  { %1442 = vmatprep.subr.mxu1 %v592_v1  ;;  %1372 = vmatpush2.msra.mxu0 %v527_v2  ;;  %v690_v1 = vld [vmem:[#allocation5 + $0x1238] sm:$0xff]  ;;  %v625_v2 = vld [vmem:[#allocation5 + $0x1030] sm:$0xff] }
 0x143   :  { %1443 = vmatpush2.msra.mxu1 %v591_v3  ;;  %1373 = vmatprep.subr.mxu0 %v526_v4  ;;  %v689_v3 = vld [vmem:[#allocation5 + $0x1230] sm:$0xff]  ;;  %v624_v4 = vld [vmem:[#allocation5 + $0x1028] sm:$0xff] }
 0x144   :  { %1444 = vmatprep.subr.mxu1 %v590_v5  ;;  %1374 = vmatpush2.msra.mxu0 %v525_v6  ;;  %v688_v5 = vld [vmem:[#allocation5 + $0x1228] sm:$0xff]  ;;  %v623_v6 = vld [vmem:[#allocation5 + $0x1020] sm:$0xff] }
 0x145   :  { %1445 = vmatpush2.msra.mxu1 %v589_v7  ;;  %1375 = vmatprep.subr.mxu0 %v524_v8  ;;  %v687_v7 = vld [vmem:[#allocation5 + $0x1220] sm:$0xff]  ;;  %v622_v8 = vld [vmem:[#allocation5 + $0x1018] sm:$0xff] }
 0x146   :  { %1446 = vmatprep.subr.mxu1 %v588_v9  ;;  %1376 = vmatpush2.msra.mxu0 %v523_v10  ;;  %v686_v9 = vld [vmem:[#allocation5 + $0x1218] sm:$0xff]  ;;  %v621_v10 = vld [vmem:[#allocation5 + $0x1010] sm:$0xff] }
 0x147   :  { %1377 = vmatprep.mubr.f32.mxu0 %v96_v11  ;;  %1447 = vmatpush2.msra.mxu1 %v587_v12  ;;  %v685_v11 = vld [vmem:[#allocation5 + $0x1210] sm:$0xff]  ;;  %v620_v12 = vld [vmem:[#allocation5 + $0x1008] sm:$0xff] }
 0x148   :  { %1378 = vmatmul.mubr.f32.vlgmr.msra.gmra.mxu0 %v95_v13  ;;  %1448 = vmatprep.mubr.f32.mxu1 %v98_v14  ;;  %v684_v13 = vld [vmem:[#allocation5 + $0x1208] sm:$0xff]  ;;  %v619_v14 = vld [vmem:[#allocation5 + $0x1000] sm:$0xff] }
 0x149   :  { %1455 = vmatprep.subr.mxu0 %v650_v15  ;;  %1526 = vmatprep.subr.mxu1 %v714_v16  ;;  %v683_v15 = vld [vmem:[#allocation5 + $0x1200] sm:$0xff]  ;;  %v682_v16 = vld [vmem:[#allocation5 + $0x11f8] sm:$0xff] }
 0x14a   :  { %1449 = vmatmul.mubr.f32.vlgmr.msra.gmra.mxu1 %v97_v17  ;;  %1456 = vmatpush1.msra.mxu0 %v649_v18  ;;  %v746_v17 = vld [vmem:[#allocation5 + $0x13f8] sm:$0xff]  ;;  %v681_v18 = vld [vmem:[#allocation5 + $0x11f0] sm:$0xff] }
 0x14b   :  { %1527 = vmatpush1.msra.mxu1 %v713_v19  ;;  %1457 = vmatprep.subr.mxu0 %v648_v20  ;;  %v745_v19 = vld [vmem:[#allocation5 + $0x13f0] sm:$0xff]  ;;  %v680_v20 = vld [vmem:[#allocation5 + $0x11e8] sm:$0xff] }
 0x14c   :  { %1528 = vmatprep.subr.mxu1 %v712_v21  ;;  %1458 = vmatpush1.msra.mxu0 %v647_v22  ;;  %v744_v21 = vld [vmem:[#allocation5 + $0x13e8] sm:$0xff]  ;;  %v679_v22 = vld [vmem:[#allocation5 + $0x11e0] sm:$0xff] }
 0x14d   :  { %1529 = vmatpush1.msra.mxu1 %v711_v23  ;;  %1459 = vmatprep.subr.mxu0 %v646_v24  ;;  %v743_v23 = vld [vmem:[#allocation5 + $0x13e0] sm:$0xff]  ;;  %v678_v24 = vld [vmem:[#allocation5 + $0x11d8] sm:$0xff] }
 0x14e   :  { %1530 = vmatprep.subr.mxu1 %v710_v25  ;;  %1460 = vmatpush1.msra.mxu0 %v645_v26  ;;  %v742_v25 = vld [vmem:[#allocation5 + $0x13d8] sm:$0xff]  ;;  %v677_v26 = vld [vmem:[#allocation5 + $0x11d0] sm:$0xff] }
 0x14f   :  { %1531 = vmatpush1.msra.mxu1 %v709_v27  ;;  %1461 = vmatprep.subr.mxu0 %v644_v28  ;;  %v741_v27 = vld [vmem:[#allocation5 + $0x13d0] sm:$0xff]  ;;  %v676_v28 = vld [vmem:[#allocation5 + $0x11c8] sm:$0xff] }
 0x150   :  { %1532 = vmatprep.subr.mxu1 %v708_v29  ;;  %1462 = vmatpush1.msra.mxu0 %v643_v30  ;;  %v740_v29 = vld [vmem:[#allocation5 + $0x13c8] sm:$0xff]  ;;  %v675_v30 = vld [vmem:[#allocation5 + $0x11c0] sm:$0xff] }
 0x151   :  { %1533 = vmatpush1.msra.mxu1 %v707_v31  ;;  %1463 = vmatprep.subr.mxu0 %v642_v32  ;;  %v739_v31 = vld [vmem:[#allocation5 + $0x13c0] sm:$0xff]  ;;  %v674_v32 = vld [vmem:[#allocation5 + $0x11b8] sm:$0xff] }
 0x152   :  { %1534 = vmatprep.subr.mxu1 %v706_v33  ;;  %1464 = vmatpush1.msra.mxu0 %v641_v34  ;;  %v738_v33 = vld [vmem:[#allocation5 + $0x13b8] sm:$0xff]  ;;  %v673_v34 = vld [vmem:[#allocation5 + $0x11b0] sm:$0xff] }
 0x153   :  { %1535 = vmatpush1.msra.mxu1 %v705_v35  ;;  %1465 = vmatprep.subr.mxu0 %v640_v36  ;;  %v737_v35 = vld [vmem:[#allocation5 + $0x13b0] sm:$0xff]  ;;  %v672_v36 = vld [vmem:[#allocation5 + $0x11a8] sm:$0xff] }
 0x154   :  { %1536 = vmatprep.subr.mxu1 %v704_v37  ;;  %1466 = vmatpush1.msra.mxu0 %v639_v38  ;;  %v736_v37 = vld [vmem:[#allocation5 + $0x13a8] sm:$0xff]  ;;  %v671_v38 = vld [vmem:[#allocation5 + $0x11a0] sm:$0xff] }
 0x155   :  { %1537 = vmatpush1.msra.mxu1 %v703_v39  ;;  %1467 = vmatprep.subr.mxu0 %v638_v40  ;;  %v735_v39 = vld [vmem:[#allocation5 + $0x13a0] sm:$0xff]  ;;  %v670_v40 = vld [vmem:[#allocation5 + $0x1198] sm:$0xff] }
 0x156   :  { %1538 = vmatprep.subr.mxu1 %v702_v41  ;;  %1468 = vmatpush1.msra.mxu0 %v637_v42  ;;  %v734_v41 = vld [vmem:[#allocation5 + $0x1398] sm:$0xff]  ;;  %v669_v42 = vld [vmem:[#allocation5 + $0x1190] sm:$0xff] }
 0x157   :  { %1539 = vmatpush1.msra.mxu1 %v701_v43  ;;  %1469 = vmatprep.subr.mxu0 %v636_v44  ;;  %v733_v43 = vld [vmem:[#allocation5 + $0x1390] sm:$0xff]  ;;  %v668_v44 = vld [vmem:[#allocation5 + $0x1188] sm:$0xff] }
 0x158   :  { %1540 = vmatprep.subr.mxu1 %v700_v45  ;;  %1470 = vmatpush1.msra.mxu0 %v635_v46  ;;  %v732_v45 = vld [vmem:[#allocation5 + $0x1388] sm:$0xff]  ;;  %v667_v46 = vld [vmem:[#allocation5 + $0x1180] sm:$0xff] }
 0x159   :  { %1541 = vmatpush1.msra.mxu1 %v699_v47  ;;  %1471 = vmatprep.subr.mxu0 %v634_v48  ;;  %v731_v47 = vld [vmem:[#allocation5 + $0x1380] sm:$0xff]  ;;  %v666_v48 = vld [vmem:[#allocation5 + $0x1178] sm:$0xff] }
 0x15a   :  { %1542 = vmatprep.subr.mxu1 %v698_v49  ;;  %1472 = vmatpush1.msra.mxu0 %v633_v50  ;;  %v730_v49 = vld [vmem:[#allocation5 + $0x1378] sm:$0xff]  ;;  %v665_v50 = vld [vmem:[#allocation5 + $0x1170] sm:$0xff] }
 0x15b   :  { %1543 = vmatpush1.msra.mxu1 %v697_v51  ;;  %1473 = vmatprep.subr.mxu0 %v632_v52  ;;  %v729_v51 = vld [vmem:[#allocation5 + $0x1370] sm:$0xff]  ;;  %v664_v52 = vld [vmem:[#allocation5 + $0x1168] sm:$0xff] }
 0x15c   :  { %1544 = vmatprep.subr.mxu1 %v696_v53  ;;  %1474 = vmatpush1.msra.mxu0 %v631_v54  ;;  %v728_v53 = vld [vmem:[#allocation5 + $0x1368] sm:$0xff]  ;;  %v663_v54 = vld [vmem:[#allocation5 + $0x1160] sm:$0xff] }
 0x15d   :  { %1545 = vmatpush1.msra.mxu1 %v695_v55  ;;  %1475 = vmatprep.subr.mxu0 %v630_v56  ;;  %v727_v55 = vld [vmem:[#allocation5 + $0x1360] sm:$0xff]  ;;  %v662_v56 = vld [vmem:[#allocation5 + $0x1158] sm:$0xff] }
 0x15e   :  { %1546 = vmatprep.subr.mxu1 %v694_v57  ;;  %1476 = vmatpush1.msra.mxu0 %v629_v58  ;;  %v726_v57 = vld [vmem:[#allocation5 + $0x1358] sm:$0xff]  ;;  %v661_v58 = vld [vmem:[#allocation5 + $0x1150] sm:$0xff] }
 0x15f   :  { %1547 = vmatpush1.msra.mxu1 %v693_v59  ;;  %1477 = vmatprep.subr.mxu0 %v628_v60  ;;  %v725_v59 = vld [vmem:[#allocation5 + $0x1350] sm:$0xff]  ;;  %v660_v60 = vld [vmem:[#allocation5 + $0x1148] sm:$0xff] }
 0x160   :  { %1548 = vmatprep.subr.mxu1 %v692_v61  ;;  %1478 = vmatpush1.msra.mxu0 %v627_v62  ;;  %v724_v61 = vld [vmem:[#allocation5 + $0x1348] sm:$0xff]  ;;  %v659_v62 = vld [vmem:[#allocation5 + $0x1140] sm:$0xff] }
 0x161   :  { %1549 = vmatpush1.msra.mxu1 %v691_v63  ;;  %1479 = vmatprep.subr.mxu0 %v626_v0  ;;  %v723_v63 = vld [vmem:[#allocation5 + $0x1340] sm:$0xff]  ;;  %v658_v0 = vld [vmem:[#allocation5 + $0x1138] sm:$0xff] }
 0x162   :  { %1550 = vmatprep.subr.mxu1 %v690_v1  ;;  %1480 = vmatpush1.msra.mxu0 %v625_v2  ;;  %v722_v1 = vld [vmem:[#allocation5 + $0x1338] sm:$0xff]  ;;  %v657_v2 = vld [vmem:[#allocation5 + $0x1130] sm:$0xff] }
 0x163   :  { %1551 = vmatpush1.msra.mxu1 %v689_v3  ;;  %1481 = vmatprep.subr.mxu0 %v624_v4  ;;  %v721_v3 = vld [vmem:[#allocation5 + $0x1330] sm:$0xff]  ;;  %v656_v4 = vld [vmem:[#allocation5 + $0x1128] sm:$0xff] }
 0x164   :  { %1552 = vmatprep.subr.mxu1 %v688_v5  ;;  %1482 = vmatpush1.msra.mxu0 %v623_v6  ;;  %v720_v5 = vld [vmem:[#allocation5 + $0x1328] sm:$0xff]  ;;  %v655_v6 = vld [vmem:[#allocation5 + $0x1120] sm:$0xff] }
 0x165   :  { %1553 = vmatpush1.msra.mxu1 %v687_v7  ;;  %1483 = vmatprep.subr.mxu0 %v622_v8  ;;  %v719_v7 = vld [vmem:[#allocation5 + $0x1320] sm:$0xff]  ;;  %v654_v8 = vld [vmem:[#allocation5 + $0x1118] sm:$0xff] }
 0x166   :  { %1554 = vmatprep.subr.mxu1 %v686_v9  ;;  %1484 = vmatpush1.msra.mxu0 %v621_v10  ;;  %v718_v9 = vld [vmem:[#allocation5 + $0x1318] sm:$0xff]  ;;  %v653_v10 = vld [vmem:[#allocation5 + $0x1110] sm:$0xff] }
 0x167   :  { %1555 = vmatpush1.msra.mxu1 %v685_v11  ;;  %1485 = vmatprep.subr.mxu0 %v620_v12  ;;  %v717_v11 = vld [vmem:[#allocation5 + $0x1310] sm:$0xff]  ;;  %v652_v12 = vld [vmem:[#allocation5 + $0x1108] sm:$0xff] }
 0x168   :  { %1556 = vmatprep.subr.mxu1 %v684_v13  ;;  %1486 = vmatpush1.msra.mxu0 %v619_v14  ;;  %v716_v13 = vld [vmem:[#allocation5 + $0x1308] sm:$0xff]  ;;  %v651_v14 = vld [vmem:[#allocation5 + $0x1100] sm:$0xff] }
 0x169   :  { %1557 = vmatpush1.msra.mxu1 %v683_v15  ;;  %1487 = vmatprep.subr.mxu0 %v682_v16  ;;  %v100_v15 = vld [vmem:[#allocation2 + $0x88] sm:$0xff]  ;;  %v715_v16 = vld [vmem:[#allocation5 + $0x1300] sm:$0xff] }
 0x16a   :  { %1558 = vmatprep.subr.mxu1 %v746_v17  ;;  %1488 = vmatpush2.msra.mxu0 %v681_v18  ;;  %v99_v17 = vld [vmem:[#allocation2 + $0x80] sm:$0xff]  ;;  %v102_v18 = vld [vmem:[#allocation2 + $0x98] sm:$0xff] }
 0x16b   :  { %1559 = vmatpush2.msra.mxu1 %v745_v19  ;;  %1489 = vmatprep.subr.mxu0 %v680_v20  ;;  %v778_v19 = vld [vmem:[#allocation5 + $0x14f8] sm:$0xff] }
 0x16c   :  { %1560 = vmatprep.subr.mxu1 %v744_v21  ;;  %1490 = vmatpush2.msra.mxu0 %v679_v22  ;;  %v842_v20 = vld [vmem:[#allocation5 + $0x16f8] sm:$0xff]  ;;  %v101_v21 = vld [vmem:[#allocation2 + $0x90] sm:$0xff] }
 0x16d   :  { %1561 = vmatpush2.msra.mxu1 %v743_v23  ;;  %1491 = vmatprep.subr.mxu0 %v678_v24  ;;  %v777_v22 = vld [vmem:[#allocation5 + $0x14f0] sm:$0xff]  ;;  %v776_v24 = vld [vmem:[#allocation5 + $0x14e8] sm:$0xff] }
 0x16e   :  { %1562 = vmatprep.subr.mxu1 %v742_v25  ;;  %1492 = vmatpush2.msra.mxu0 %v677_v26  ;;  %v841_v23 = vld [vmem:[#allocation5 + $0x16f0] sm:$0xff]  ;;  %v840_v25 = vld [vmem:[#allocation5 + $0x16e8] sm:$0xff]  ;;  %v775_v26 = vld [vmem:[#allocation5 + $0x14e0] sm:$0xff] }
 0x16f   :  { %1563 = vmatpush2.msra.mxu1 %v741_v27  ;;  %1493 = vmatprep.subr.mxu0 %v676_v28  ;;  %v839_v27 = vld [vmem:[#allocation5 + $0x16e0] sm:$0xff]  ;;  %v774_v28 = vld [vmem:[#allocation5 + $0x14d8] sm:$0xff] }
 0x170   :  { %1564 = vmatprep.subr.mxu1 %v740_v29  ;;  %1494 = vmatpush2.msra.mxu0 %v675_v30  ;;  %v838_v29 = vld [vmem:[#allocation5 + $0x16d8] sm:$0xff]  ;;  %v773_v30 = vld [vmem:[#allocation5 + $0x14d0] sm:$0xff] }
 0x171   :  { %1565 = vmatpush2.msra.mxu1 %v739_v31  ;;  %1495 = vmatprep.subr.mxu0 %v674_v32  ;;  %v837_v31 = vld [vmem:[#allocation5 + $0x16d0] sm:$0xff]  ;;  %v772_v32 = vld [vmem:[#allocation5 + $0x14c8] sm:$0xff] }
 0x172   :  { %1566 = vmatprep.subr.mxu1 %v738_v33  ;;  %1496 = vmatpush2.msra.mxu0 %v673_v34  ;;  %v836_v33 = vld [vmem:[#allocation5 + $0x16c8] sm:$0xff]  ;;  %v771_v34 = vld [vmem:[#allocation5 + $0x14c0] sm:$0xff] }
 0x173   :  { %1567 = vmatpush2.msra.mxu1 %v737_v35  ;;  %1497 = vmatprep.subr.mxu0 %v672_v36  ;;  %v835_v35 = vld [vmem:[#allocation5 + $0x16c0] sm:$0xff]  ;;  %v770_v36 = vld [vmem:[#allocation5 + $0x14b8] sm:$0xff] }
 0x174   :  { %1568 = vmatprep.subr.mxu1 %v736_v37  ;;  %1498 = vmatpush2.msra.mxu0 %v671_v38  ;;  %v834_v37 = vld [vmem:[#allocation5 + $0x16b8] sm:$0xff]  ;;  %v769_v38 = vld [vmem:[#allocation5 + $0x14b0] sm:$0xff] }
 0x175   :  { %1569 = vmatpush2.msra.mxu1 %v735_v39  ;;  %1499 = vmatprep.subr.mxu0 %v670_v40  ;;  %v833_v39 = vld [vmem:[#allocation5 + $0x16b0] sm:$0xff]  ;;  %v768_v40 = vld [vmem:[#allocation5 + $0x14a8] sm:$0xff] }
 0x176   :  { %1570 = vmatprep.subr.mxu1 %v734_v41  ;;  %1500 = vmatpush2.msra.mxu0 %v669_v42  ;;  %v832_v41 = vld [vmem:[#allocation5 + $0x16a8] sm:$0xff]  ;;  %v767_v42 = vld [vmem:[#allocation5 + $0x14a0] sm:$0xff] }
 0x177   :  { %1571 = vmatpush2.msra.mxu1 %v733_v43  ;;  %1501 = vmatprep.subr.mxu0 %v668_v44  ;;  %v831_v43 = vld [vmem:[#allocation5 + $0x16a0] sm:$0xff]  ;;  %v766_v44 = vld [vmem:[#allocation5 + $0x1498] sm:$0xff] }
 0x178   :  { %1572 = vmatprep.subr.mxu1 %v732_v45  ;;  %1502 = vmatpush2.msra.mxu0 %v667_v46  ;;  %v830_v45 = vld [vmem:[#allocation5 + $0x1698] sm:$0xff]  ;;  %v765_v46 = vld [vmem:[#allocation5 + $0x1490] sm:$0xff] }
 0x179   :  { %1573 = vmatpush2.msra.mxu1 %v731_v47  ;;  %1503 = vmatprep.subr.mxu0 %v666_v48  ;;  %v829_v47 = vld [vmem:[#allocation5 + $0x1690] sm:$0xff]  ;;  %v764_v48 = vld [vmem:[#allocation5 + $0x1488] sm:$0xff] }
 0x17a   :  { %1574 = vmatprep.subr.mxu1 %v730_v49  ;;  %1504 = vmatpush2.msra.mxu0 %v665_v50  ;;  %v828_v49 = vld [vmem:[#allocation5 + $0x1688] sm:$0xff]  ;;  %v763_v50 = vld [vmem:[#allocation5 + $0x1480] sm:$0xff] }
 0x17b   :  { %1575 = vmatpush2.msra.mxu1 %v729_v51  ;;  %1505 = vmatprep.subr.mxu0 %v664_v52  ;;  %v827_v51 = vld [vmem:[#allocation5 + $0x1680] sm:$0xff]  ;;  %v762_v52 = vld [vmem:[#allocation5 + $0x1478] sm:$0xff] }
 0x17c   :  { %1576 = vmatprep.subr.mxu1 %v728_v53  ;;  %1506 = vmatpush2.msra.mxu0 %v663_v54  ;;  %v826_v53 = vld [vmem:[#allocation5 + $0x1678] sm:$0xff]  ;;  %v761_v54 = vld [vmem:[#allocation5 + $0x1470] sm:$0xff] }
 0x17d   :  { %1577 = vmatpush2.msra.mxu1 %v727_v55  ;;  %1507 = vmatprep.subr.mxu0 %v662_v56  ;;  %v825_v55 = vld [vmem:[#allocation5 + $0x1670] sm:$0xff]  ;;  %v760_v56 = vld [vmem:[#allocation5 + $0x1468] sm:$0xff] }
 0x17e   :  { %1578 = vmatprep.subr.mxu1 %v726_v57  ;;  %1508 = vmatpush2.msra.mxu0 %v661_v58  ;;  %v824_v57 = vld [vmem:[#allocation5 + $0x1668] sm:$0xff]  ;;  %v759_v58 = vld [vmem:[#allocation5 + $0x1460] sm:$0xff] }
 0x17f   :  { %1579 = vmatpush2.msra.mxu1 %v725_v59  ;;  %1509 = vmatprep.subr.mxu0 %v660_v60  ;;  %v823_v59 = vld [vmem:[#allocation5 + $0x1660] sm:$0xff]  ;;  %v758_v60 = vld [vmem:[#allocation5 + $0x1458] sm:$0xff] }
 0x180   :  { %1580 = vmatprep.subr.mxu1 %v724_v61  ;;  %1510 = vmatpush2.msra.mxu0 %v659_v62  ;;  %v822_v61 = vld [vmem:[#allocation5 + $0x1658] sm:$0xff]  ;;  %v757_v62 = vld [vmem:[#allocation5 + $0x1450] sm:$0xff] }
 0x181   :  { %1581 = vmatpush2.msra.mxu1 %v723_v63  ;;  %1511 = vmatprep.subr.mxu0 %v658_v0  ;;  %v821_v63 = vld [vmem:[#allocation5 + $0x1650] sm:$0xff]  ;;  %v756_v0 = vld [vmem:[#allocation5 + $0x1448] sm:$0xff] }
 0x182   :  { %1582 = vmatprep.subr.mxu1 %v722_v1  ;;  %1512 = vmatpush2.msra.mxu0 %v657_v2  ;;  %v820_v1 = vld [vmem:[#allocation5 + $0x1648] sm:$0xff]  ;;  %v755_v2 = vld [vmem:[#allocation5 + $0x1440] sm:$0xff] }
 0x183   :  { %1583 = vmatpush2.msra.mxu1 %v721_v3  ;;  %1513 = vmatprep.subr.mxu0 %v656_v4  ;;  %v819_v3 = vld [vmem:[#allocation5 + $0x1640] sm:$0xff]  ;;  %v754_v4 = vld [vmem:[#allocation5 + $0x1438] sm:$0xff] }
 0x184   :  { %1584 = vmatprep.subr.mxu1 %v720_v5  ;;  %1514 = vmatpush2.msra.mxu0 %v655_v6  ;;  %v818_v5 = vld [vmem:[#allocation5 + $0x1638] sm:$0xff]  ;;  %v753_v6 = vld [vmem:[#allocation5 + $0x1430] sm:$0xff] }
 0x185   :  { %1585 = vmatpush2.msra.mxu1 %v719_v7  ;;  %1515 = vmatprep.subr.mxu0 %v654_v8  ;;  %v817_v7 = vld [vmem:[#allocation5 + $0x1630] sm:$0xff]  ;;  %v752_v8 = vld [vmem:[#allocation5 + $0x1428] sm:$0xff] }
 0x186   :  { %1586 = vmatprep.subr.mxu1 %v718_v9  ;;  %1516 = vmatpush2.msra.mxu0 %v653_v10  ;;  %v816_v9 = vld [vmem:[#allocation5 + $0x1628] sm:$0xff]  ;;  %v751_v10 = vld [vmem:[#allocation5 + $0x1420] sm:$0xff] }
 0x187   :  { %1587 = vmatpush2.msra.mxu1 %v717_v11  ;;  %1517 = vmatprep.subr.mxu0 %v652_v12  ;;  %v815_v11 = vld [vmem:[#allocation5 + $0x1620] sm:$0xff]  ;;  %v750_v12 = vld [vmem:[#allocation5 + $0x1418] sm:$0xff] }
 0x188   :  { %1588 = vmatprep.subr.mxu1 %v716_v13  ;;  %1518 = vmatpush2.msra.mxu0 %v651_v14  ;;  %v814_v13 = vld [vmem:[#allocation5 + $0x1618] sm:$0xff]  ;;  %v749_v14 = vld [vmem:[#allocation5 + $0x1410] sm:$0xff] }
 0x189   :  { %1519 = vmatprep.mubr.f32.mxu0 %v100_v15  ;;  %1589 = vmatpush2.msra.mxu1 %v715_v16  ;;  %v813_v15 = vld [vmem:[#allocation5 + $0x1610] sm:$0xff]  ;;  %v748_v16 = vld [vmem:[#allocation5 + $0x1408] sm:$0xff] }
 0x18a   :  { %1520 = vmatmul.mubr.f32.vlgmr.msra.gmra.mxu0 %v99_v17  ;;  %1590 = vmatprep.mubr.f32.mxu1 %v102_v18  ;;  %v812_v17 = vld [vmem:[#allocation5 + $0x1608] sm:$0xff]  ;;  %v747_v18 = vld [vmem:[#allocation5 + $0x1400] sm:$0xff] }
 0x18b   :  { %1597 = vmatprep.subr.mxu0 %v778_v19  ;;  %1668 = vmatprep.subr.mxu1 %v842_v20  ;;  %v811_v19 = vld [vmem:[#allocation5 + $0x1600] sm:$0xff]  ;;  %v810_v20 = vld [vmem:[#allocation5 + $0x15f8] sm:$0xff] }
 0x18c   :  { %1591 = vmatmul.mubr.f32.vlgmr.msra.gmra.mxu1 %v101_v21  ;;  %1598 = vmatpush1.msra.mxu0 %v777_v22  ;;  %v874_v21 = vld [vmem:[#allocation5 + $0x17f8] sm:$0xff]  ;;  %v809_v22 = vld [vmem:[#allocation5 + $0x15f0] sm:$0xff] }
 0x18d   :  { %1669 = vmatpush1.msra.mxu1 %v841_v23  ;;  %1599 = vmatprep.subr.mxu0 %v776_v24  ;;  %v873_v23 = vld [vmem:[#allocation5 + $0x17f0] sm:$0xff]  ;;  %v808_v24 = vld [vmem:[#allocation5 + $0x15e8] sm:$0xff] }
 0x18e   :  { %1670 = vmatprep.subr.mxu1 %v840_v25  ;;  %1600 = vmatpush1.msra.mxu0 %v775_v26  ;;  %v872_v25 = vld [vmem:[#allocation5 + $0x17e8] sm:$0xff]  ;;  %v807_v26 = vld [vmem:[#allocation5 + $0x15e0] sm:$0xff] }
 0x18f   :  { %1671 = vmatpush1.msra.mxu1 %v839_v27  ;;  %1601 = vmatprep.subr.mxu0 %v774_v28  ;;  %v871_v27 = vld [vmem:[#allocation5 + $0x17e0] sm:$0xff]  ;;  %v806_v28 = vld [vmem:[#allocation5 + $0x15d8] sm:$0xff] }
 0x190   :  { %1672 = vmatprep.subr.mxu1 %v838_v29  ;;  %1602 = vmatpush1.msra.mxu0 %v773_v30  ;;  %v870_v29 = vld [vmem:[#allocation5 + $0x17d8] sm:$0xff]  ;;  %v805_v30 = vld [vmem:[#allocation5 + $0x15d0] sm:$0xff] }
 0x191   :  { %1673 = vmatpush1.msra.mxu1 %v837_v31  ;;  %1603 = vmatprep.subr.mxu0 %v772_v32  ;;  %v869_v31 = vld [vmem:[#allocation5 + $0x17d0] sm:$0xff]  ;;  %v804_v32 = vld [vmem:[#allocation5 + $0x15c8] sm:$0xff] }
 0x192   :  { %1674 = vmatprep.subr.mxu1 %v836_v33  ;;  %1604 = vmatpush1.msra.mxu0 %v771_v34  ;;  %v868_v33 = vld [vmem:[#allocation5 + $0x17c8] sm:$0xff]  ;;  %v803_v34 = vld [vmem:[#allocation5 + $0x15c0] sm:$0xff] }
 0x193   :  { %1675 = vmatpush1.msra.mxu1 %v835_v35  ;;  %1605 = vmatprep.subr.mxu0 %v770_v36  ;;  %v867_v35 = vld [vmem:[#allocation5 + $0x17c0] sm:$0xff]  ;;  %v802_v36 = vld [vmem:[#allocation5 + $0x15b8] sm:$0xff] }
 0x194   :  { %1676 = vmatprep.subr.mxu1 %v834_v37  ;;  %1606 = vmatpush1.msra.mxu0 %v769_v38  ;;  %v866_v37 = vld [vmem:[#allocation5 + $0x17b8] sm:$0xff]  ;;  %v801_v38 = vld [vmem:[#allocation5 + $0x15b0] sm:$0xff] }
 0x195   :  { %1677 = vmatpush1.msra.mxu1 %v833_v39  ;;  %1607 = vmatprep.subr.mxu0 %v768_v40  ;;  %v865_v39 = vld [vmem:[#allocation5 + $0x17b0] sm:$0xff]  ;;  %v800_v40 = vld [vmem:[#allocation5 + $0x15a8] sm:$0xff] }
 0x196   :  { %1678 = vmatprep.subr.mxu1 %v832_v41  ;;  %1608 = vmatpush1.msra.mxu0 %v767_v42  ;;  %v864_v41 = vld [vmem:[#allocation5 + $0x17a8] sm:$0xff]  ;;  %v799_v42 = vld [vmem:[#allocation5 + $0x15a0] sm:$0xff] }
 0x197   :  { %1679 = vmatpush1.msra.mxu1 %v831_v43  ;;  %1609 = vmatprep.subr.mxu0 %v766_v44  ;;  %v863_v43 = vld [vmem:[#allocation5 + $0x17a0] sm:$0xff]  ;;  %v798_v44 = vld [vmem:[#allocation5 + $0x1598] sm:$0xff] }
 0x198   :  { %1680 = vmatprep.subr.mxu1 %v830_v45  ;;  %1610 = vmatpush1.msra.mxu0 %v765_v46  ;;  %v862_v45 = vld [vmem:[#allocation5 + $0x1798] sm:$0xff]  ;;  %v797_v46 = vld [vmem:[#allocation5 + $0x1590] sm:$0xff] }
 0x199   :  { %1681 = vmatpush1.msra.mxu1 %v829_v47  ;;  %1611 = vmatprep.subr.mxu0 %v764_v48  ;;  %v861_v47 = vld [vmem:[#allocation5 + $0x1790] sm:$0xff]  ;;  %v796_v48 = vld [vmem:[#allocation5 + $0x1588] sm:$0xff] }
 0x19a   :  { %1682 = vmatprep.subr.mxu1 %v828_v49  ;;  %1612 = vmatpush1.msra.mxu0 %v763_v50  ;;  %v860_v49 = vld [vmem:[#allocation5 + $0x1788] sm:$0xff]  ;;  %v795_v50 = vld [vmem:[#allocation5 + $0x1580] sm:$0xff] }
 0x19b   :  { %1683 = vmatpush1.msra.mxu1 %v827_v51  ;;  %1613 = vmatprep.subr.mxu0 %v762_v52  ;;  %v859_v51 = vld [vmem:[#allocation5 + $0x1780] sm:$0xff]  ;;  %v794_v52 = vld [vmem:[#allocation5 + $0x1578] sm:$0xff] }
 0x19c   :  { %1684 = vmatprep.subr.mxu1 %v826_v53  ;;  %1614 = vmatpush1.msra.mxu0 %v761_v54  ;;  %v858_v53 = vld [vmem:[#allocation5 + $0x1778] sm:$0xff]  ;;  %v793_v54 = vld [vmem:[#allocation5 + $0x1570] sm:$0xff] }
 0x19d   :  { %1685 = vmatpush1.msra.mxu1 %v825_v55  ;;  %1615 = vmatprep.subr.mxu0 %v760_v56  ;;  %v857_v55 = vld [vmem:[#allocation5 + $0x1770] sm:$0xff]  ;;  %v792_v56 = vld [vmem:[#allocation5 + $0x1568] sm:$0xff] }
 0x19e   :  { %1686 = vmatprep.subr.mxu1 %v824_v57  ;;  %1616 = vmatpush1.msra.mxu0 %v759_v58  ;;  %v856_v57 = vld [vmem:[#allocation5 + $0x1768] sm:$0xff]  ;;  %v791_v58 = vld [vmem:[#allocation5 + $0x1560] sm:$0xff] }
 0x19f   :  { %1687 = vmatpush1.msra.mxu1 %v823_v59  ;;  %1617 = vmatprep.subr.mxu0 %v758_v60  ;;  %v855_v59 = vld [vmem:[#allocation5 + $0x1760] sm:$0xff]  ;;  %v790_v60 = vld [vmem:[#allocation5 + $0x1558] sm:$0xff] }
 0x1a0   :  { %1688 = vmatprep.subr.mxu1 %v822_v61  ;;  %1618 = vmatpush1.msra.mxu0 %v757_v62  ;;  %v854_v61 = vld [vmem:[#allocation5 + $0x1758] sm:$0xff]  ;;  %v789_v62 = vld [vmem:[#allocation5 + $0x1550] sm:$0xff] }
 0x1a1   :  { %1689 = vmatpush1.msra.mxu1 %v821_v63  ;;  %1619 = vmatprep.subr.mxu0 %v756_v0  ;;  %v853_v63 = vld [vmem:[#allocation5 + $0x1750] sm:$0xff]  ;;  %v788_v0 = vld [vmem:[#allocation5 + $0x1548] sm:$0xff] }
 0x1a2   :  { %1690 = vmatprep.subr.mxu1 %v820_v1  ;;  %1620 = vmatpush1.msra.mxu0 %v755_v2  ;;  %v852_v1 = vld [vmem:[#allocation5 + $0x1748] sm:$0xff]  ;;  %v787_v2 = vld [vmem:[#allocation5 + $0x1540] sm:$0xff] }
 0x1a3   :  { %1691 = vmatpush1.msra.mxu1 %v819_v3  ;;  %1621 = vmatprep.subr.mxu0 %v754_v4  ;;  %v851_v3 = vld [vmem:[#allocation5 + $0x1740] sm:$0xff]  ;;  %v786_v4 = vld [vmem:[#allocation5 + $0x1538] sm:$0xff] }
 0x1a4   :  { %1692 = vmatprep.subr.mxu1 %v818_v5  ;;  %1622 = vmatpush1.msra.mxu0 %v753_v6  ;;  %v850_v5 = vld [vmem:[#allocation5 + $0x1738] sm:$0xff]  ;;  %v785_v6 = vld [vmem:[#allocation5 + $0x1530] sm:$0xff] }
 0x1a5   :  { %1693 = vmatpush1.msra.mxu1 %v817_v7  ;;  %1623 = vmatprep.subr.mxu0 %v752_v8  ;;  %v849_v7 = vld [vmem:[#allocation5 + $0x1730] sm:$0xff]  ;;  %v784_v8 = vld [vmem:[#allocation5 + $0x1528] sm:$0xff] }
 0x1a6   :  { %1694 = vmatprep.subr.mxu1 %v816_v9  ;;  %1624 = vmatpush1.msra.mxu0 %v751_v10  ;;  %v848_v9 = vld [vmem:[#allocation5 + $0x1728] sm:$0xff]  ;;  %v783_v10 = vld [vmem:[#allocation5 + $0x1520] sm:$0xff] }
 0x1a7   :  { %1695 = vmatpush1.msra.mxu1 %v815_v11  ;;  %1625 = vmatprep.subr.mxu0 %v750_v12  ;;  %v847_v11 = vld [vmem:[#allocation5 + $0x1720] sm:$0xff]  ;;  %v782_v12 = vld [vmem:[#allocation5 + $0x1518] sm:$0xff] }
 0x1a8   :  { %1696 = vmatprep.subr.mxu1 %v814_v13  ;;  %1626 = vmatpush1.msra.mxu0 %v749_v14  ;;  %v846_v13 = vld [vmem:[#allocation5 + $0x1718] sm:$0xff]  ;;  %v781_v14 = vld [vmem:[#allocation5 + $0x1510] sm:$0xff] }
 0x1a9   :  { %1697 = vmatpush1.msra.mxu1 %v813_v15  ;;  %1627 = vmatprep.subr.mxu0 %v748_v16  ;;  %v845_v15 = vld [vmem:[#allocation5 + $0x1710] sm:$0xff]  ;;  %v780_v16 = vld [vmem:[#allocation5 + $0x1508] sm:$0xff] }
 0x1aa   :  { %1698 = vmatprep.subr.mxu1 %v812_v17  ;;  %1628 = vmatpush1.msra.mxu0 %v747_v18  ;;  %v844_v17 = vld [vmem:[#allocation5 + $0x1708] sm:$0xff]  ;;  %v779_v18 = vld [vmem:[#allocation5 + $0x1500] sm:$0xff] }
 0x1ab   :  { %1699 = vmatpush1.msra.mxu1 %v811_v19  ;;  %1629 = vmatprep.subr.mxu0 %v810_v20  ;;  %v104_v19 = vld [vmem:[#allocation2 + $0xa8] sm:$0xff]  ;;  %v843_v20 = vld [vmem:[#allocation5 + $0x1700] sm:$0xff] }
 0x1ac   :  { %1700 = vmatprep.subr.mxu1 %v874_v21  ;;  %1630 = vmatpush2.msra.mxu0 %v809_v22  ;;  %v106_v21 = vld [vmem:[#allocation2 + $0xb8] sm:$0xff]  ;;  %v103_v22 = vld [vmem:[#allocation2 + $0xa0] sm:$0xff] }
 0x1ad   :  { %1701 = vmatpush2.msra.mxu1 %v873_v23  ;;  %1631 = vmatprep.subr.mxu0 %v808_v24  ;;  %v105_v23 = vld [vmem:[#allocation2 + $0xb0] sm:$0xff]  ;;  %v1772_v24 = vld [vmem:[#allocation8 + $0xf8] sm:$0xff] }
 0x1ae   :  { %1702 = vmatprep.subr.mxu1 %v872_v25  ;;  %1632 = vmatpush2.msra.mxu0 %v807_v26  ;;  %v1756_v25 = vld [vmem:[#allocation8 + $0x78] sm:$0xff]  ;;  %v1771_v26 = vld [vmem:[#allocation8 + $0xf0] sm:$0xff] }
 0x1af   :  { %1703 = vmatpush2.msra.mxu1 %v871_v27  ;;  %1633 = vmatprep.subr.mxu0 %v806_v28  ;;  %v1755_v27 = vld [vmem:[#allocation8 + $0x70] sm:$0xff]  ;;  %v1770_v28 = vld [vmem:[#allocation8 + $0xe8] sm:$0xff] }
 0x1b0   :  { %1704 = vmatprep.subr.mxu1 %v870_v29  ;;  %1634 = vmatpush2.msra.mxu0 %v805_v30  ;;  %v1754_v29 = vld [vmem:[#allocation8 + $0x68] sm:$0xff]  ;;  %v1769_v30 = vld [vmem:[#allocation8 + $0xe0] sm:$0xff] }
 0x1b1   :  { %1705 = vmatpush2.msra.mxu1 %v869_v31  ;;  %1635 = vmatprep.subr.mxu0 %v804_v32  ;;  %v1753_v31 = vld [vmem:[#allocation8 + $0x60] sm:$0xff]  ;;  %v1768_v32 = vld [vmem:[#allocation8 + $0xd8] sm:$0xff] }
 0x1b2   :  { %1706 = vmatprep.subr.mxu1 %v868_v33  ;;  %1636 = vmatpush2.msra.mxu0 %v803_v34  ;;  %v1752_v33 = vld [vmem:[#allocation8 + $0x58] sm:$0xff]  ;;  %v1767_v34 = vld [vmem:[#allocation8 + $0xd0] sm:$0xff] }
 0x1b3   :  { %1707 = vmatpush2.msra.mxu1 %v867_v35  ;;  %1637 = vmatprep.subr.mxu0 %v802_v36  ;;  %v1751_v35 = vld [vmem:[#allocation8 + $0x50] sm:$0xff]  ;;  %v1766_v36 = vld [vmem:[#allocation8 + $0xc8] sm:$0xff] }
 0x1b4   :  { %1708 = vmatprep.subr.mxu1 %v866_v37  ;;  %1638 = vmatpush2.msra.mxu0 %v801_v38  ;;  %v1750_v37 = vld [vmem:[#allocation8 + $0x48] sm:$0xff]  ;;  %v1765_v38 = vld [vmem:[#allocation8 + $0xc0] sm:$0xff] }
 0x1b5   :  { %1709 = vmatpush2.msra.mxu1 %v865_v39  ;;  %1639 = vmatprep.subr.mxu0 %v800_v40  ;;  %v1749_v39 = vld [vmem:[#allocation8 + $0x40] sm:$0xff]  ;;  %v1764_v40 = vld [vmem:[#allocation8 + $0xb8] sm:$0xff] }
 0x1b6   :  { %1710 = vmatprep.subr.mxu1 %v864_v41  ;;  %1640 = vmatpush2.msra.mxu0 %v799_v42  ;;  %v1748_v41 = vld [vmem:[#allocation8 + $0x38] sm:$0xff]  ;;  %v1763_v42 = vld [vmem:[#allocation8 + $0xb0] sm:$0xff] }
 0x1b7   :  { %1711 = vmatpush2.msra.mxu1 %v863_v43  ;;  %1641 = vmatprep.subr.mxu0 %v798_v44  ;;  %v1747_v43 = vld [vmem:[#allocation8 + $0x30] sm:$0xff]  ;;  %v1762_v44 = vld [vmem:[#allocation8 + $0xa8] sm:$0xff] }
 0x1b8   :  { %1712 = vmatprep.subr.mxu1 %v862_v45  ;;  %1642 = vmatpush2.msra.mxu0 %v797_v46  ;;  %v1746_v45 = vld [vmem:[#allocation8 + $0x28] sm:$0xff]  ;;  %v1761_v46 = vld [vmem:[#allocation8 + $0xa0] sm:$0xff] }
 0x1b9   :  { %1713 = vmatpush2.msra.mxu1 %v861_v47  ;;  %1643 = vmatprep.subr.mxu0 %v796_v48  ;;  %v1745_v47 = vld [vmem:[#allocation8 + $0x20] sm:$0xff]  ;;  %v1760_v48 = vld [vmem:[#allocation8 + $0x98] sm:$0xff] }
 0x1ba   :  { %1714 = vmatprep.subr.mxu1 %v860_v49  ;;  %1644 = vmatpush2.msra.mxu0 %v795_v50  ;;  %v1744_v49 = vld [vmem:[#allocation8 + $0x18] sm:$0xff]  ;;  %v1759_v50 = vld [vmem:[#allocation8 + $0x90] sm:$0xff] }
 0x1bb   :  { %1715 = vmatpush2.msra.mxu1 %v859_v51  ;;  %1645 = vmatprep.subr.mxu0 %v794_v52  ;;  %v1743_v51 = vld [vmem:[#allocation8 + $0x10] sm:$0xff]  ;;  %v1758_v52 = vld [vmem:[#allocation8 + $0x88] sm:$0xff] }
 0x1bc   :  { %1716 = vmatprep.subr.mxu1 %v858_v53  ;;  %1646 = vmatpush2.msra.mxu0 %v793_v54  ;;  %v1742_v53 = vld [vmem:[#allocation8 + $0x8] sm:$0xff]  ;;  %v1757_v54 = vld [vmem:[#allocation8 + $0x80] sm:$0xff] }
 0x1bd   :  { %1717 = vmatpush2.msra.mxu1 %v857_v55  ;;  %1647 = vmatprep.subr.mxu0 %v792_v56  ;;  %v1741_v55 = vld [vmem:[#allocation8] sm:$0xff]  ;;  %v877_v56 = vlaneseq }
 0x1be   :  { %1718 = vmatprep.subr.mxu1 %v856_v57  ;;  %1648 = vmatpush2.msra.mxu0 %v791_v58 }
 0x1bf   :  { %1719 = vmatpush2.msra.mxu1 %v855_v59  ;;  %1649 = vmatprep.subr.mxu0 %v790_v60  ;;  %v878_v57 = vshrl.u32 %v877_v56, 7  ;;  %v875_v59 = vld [vmem:[#allocation7] sm:$0x3] }
 0x1c0   :  { %1720 = vmatprep.subr.mxu1 %v854_v61  ;;  %1650 = vmatpush2.msra.mxu0 %v789_v62  ;;  %v953_v61 = vpop.f32.mrf.mxu0 }
 0x1c1   :  { %1721 = vmatpush2.msra.mxu1 %v853_v63  ;;  %1651 = vmatprep.subr.mxu0 %v788_v0  ;;  %v879_v58 = vsub.s32 0, %v878_v57  ;;  %v883_v60 = vsub.s32 1, %v878_v57  ;;  %v1024_v0 = vpop.f32.mrf.mxu1 }
 0x1c2   :  { %1722 = vmatprep.subr.mxu1 %v852_v1  ;;  %1652 = vmatpush2.msra.mxu0 %v787_v2  ;;  %v955_v1 = vpop.f32.mrf.mxu0 }
 0x1c3   :  { %1723 = vmatpush2.msra.mxu1 %v851_v3  ;;  %1653 = vmatprep.subr.mxu0 %v786_v4  ;;  %v880_v62 = vrot.slane %v875_v59, %v879_v58  ;;  %v884_v63 = vrot.slane %v875_v59, %v883_v60 }
 0x1c4   :  { %1724 = vmatprep.subr.mxu1 %v850_v5  ;;  %1654 = vmatpush2.msra.mxu0 %v785_v6  ;;  %v1095_v3 = vpop.f32.mrf.mxu0  ;;  %v1026_v5 = vpop.f32.mrf.mxu1 }
 0x1c5   :  { %1725 = vmatpush2.msra.mxu1 %v849_v7  ;;  %1655 = vmatprep.subr.mxu0 %v784_v8  ;;  %v954_v2 = vadd.f32 %v953_v61, %v880_v62  ;;  %v956_v4 = vadd.f32 %v955_v1, %v884_v63 }
 0x1c6   :  { %1726 = vmatprep.subr.mxu1 %v848_v9  ;;  %1656 = vmatpush2.msra.mxu0 %v783_v10  ;;  %v1166_v7 = vpop.f32.mrf.mxu1  ;;  %v1097_v8 = vpop.f32.mrf.mxu0 }
 0x1c7   :  { %1727 = vmatpush2.msra.mxu1 %v847_v11  ;;  %1657 = vmatprep.subr.mxu0 %v782_v12  ;;  %v1025_v6 = vadd.f32 %v1024_v0, %v954_v2  ;;  %v1027_v9 = vadd.f32 %v1026_v5, %v956_v4 }
 0x1c8   :  { %1728 = vmatprep.subr.mxu1 %v846_v13  ;;  %1658 = vmatpush2.msra.mxu0 %v781_v14  ;;  %v1237_v11 = vpop.f32.mrf.mxu0  ;;  %v1168_v13 = vpop.f32.mrf.mxu1 }
 0x1c9   :  { %1729 = vmatpush2.msra.mxu1 %v845_v15  ;;  %1659 = vmatprep.subr.mxu0 %v780_v16  ;;  %v1096_v10 = vadd.f32 %v1095_v3, %v1025_v6  ;;  %v1098_v12 = vadd.f32 %v1097_v8, %v1027_v9 }
 0x1ca   :  { %1730 = vmatprep.subr.mxu1 %v844_v17  ;;  %1660 = vmatpush2.msra.mxu0 %v779_v18  ;;  %v1308_v15 = vpop.f32.mrf.mxu1  ;;  %v1239_v16 = vpop.f32.mrf.mxu0 }
 0x1cb   :  { %1661 = vmatprep.mubr.f32.mxu0 %v104_v19  ;;  %1731 = vmatpush2.msra.mxu1 %v843_v20  ;;  %v1167_v14 = vadd.f32 %v1166_v7, %v1096_v10  ;;  %v1169_v17 = vadd.f32 %v1168_v13, %v1098_v12 }
 0x1cc   :  { %1732 = vmatprep.mubr.f32.mxu1 %v106_v21  ;;  %1662 = vmatmul.mubr.f32.vlgmr.msra.gmra.mxu0 %v103_v22  ;;  %v1310_v21 = vpop.f32.mrf.mxu1 }
 0x1cd   :  { %1733 = vmatmul.mubr.f32.vlgmr.msra.gmra.mxu1 %v105_v23  ;;  %1869 = vmatprep.subr.mxu0 %v1772_v24  ;;  %v1238_v18 = vadd.f32 %v1237_v11, %v1167_v14  ;;  %v1240_v20 = vadd.f32 %v1239_v16, %v1169_v17 }
 0x1ce   :  { %1870 = vmatpush3.msra.mxu0 %v1756_v25 }
 0x1cf   :  { %1871 = vmatprep.subr.mxu0 %v1771_v26  ;;  %v1309_v22 = vadd.f32 %v1308_v15, %v1238_v18  ;;  %v1311_v25 = vadd.f32 %v1310_v21, %v1240_v20 }
 0x1d0   :  { %1872 = vmatpush3.msra.mxu0 %v1755_v27 }
 0x1d1   :  { %1873 = vmatprep.subr.mxu0 %v1770_v28 }
 0x1d2   :  { %1874 = vmatpush3.msra.mxu0 %v1754_v29 }
 0x1d3   :  { %1875 = vmatprep.subr.mxu0 %v1769_v30 }
 0x1d4   :  { %1876 = vmatpush3.msra.mxu0 %v1753_v31 }
 0x1d5   :  { %1877 = vmatprep.subr.mxu0 %v1768_v32 }
 0x1d6   :  { %1878 = vmatpush3.msra.mxu0 %v1752_v33 }
 0x1d7   :  { %1879 = vmatprep.subr.mxu0 %v1767_v34 }
 0x1d8   :  { %1880 = vmatpush3.msra.mxu0 %v1751_v35 }
 0x1d9   :  { %1881 = vmatprep.subr.mxu0 %v1766_v36 }
 0x1da   :  { %1882 = vmatpush3.msra.mxu0 %v1750_v37 }
 0x1db   :  { %1883 = vmatprep.subr.mxu0 %v1765_v38 }
 0x1dc   :  { %1884 = vmatpush3.msra.mxu0 %v1749_v39 }
 0x1dd   :  { %1885 = vmatprep.subr.mxu0 %v1764_v40 }
 0x1de   :  { %1886 = vmatpush3.msra.mxu0 %v1748_v41 }
 0x1df   :  { %1887 = vmatprep.subr.mxu0 %v1763_v42 }
 0x1e0   :  { %1888 = vmatpush3.msra.mxu0 %v1747_v43 }
 0x1e1   :  { %1889 = vmatprep.subr.mxu0 %v1762_v44 }
 0x1e2   :  { %1890 = vmatpush3.msra.mxu0 %v1746_v45 }
 0x1e3   :  { %1891 = vmatprep.subr.mxu0 %v1761_v46 }
 0x1e4   :  { %1892 = vmatpush3.msra.mxu0 %v1745_v47 }
 0x1e5   :  { %1893 = vmatprep.subr.mxu0 %v1760_v48 }
 0x1e6   :  { %1894 = vmatpush3.msra.mxu0 %v1744_v49 }
 0x1e7   :  { %1895 = vmatprep.subr.mxu0 %v1759_v50  ;;  %v1868_v50 = vld [vmem:[#allocation10] ss:$0 sm:$0xff] }
 0x1e8   :  { %1896 = vmatpush3.msra.mxu0 %v1743_v51 }
 0x1e9   :  { %1897 = vmatprep.subr.mxu0 %v1758_v52 }
 0x1ea   :  { %1898 = vmatpush3.msra.mxu0 %v1742_v53 }
 0x1eb   :  { %1899 = vmatprep.subr.mxu0 %v1757_v54 }
 0x1ec   :  { %1900 = vmatpush3.msra.mxu0 %v1741_v55 }
 0x208   :  { %v1379_v19 = vpop.f32.mrf.mxu0 }
 0x209   :  { %v1380_v26 = vadd.f32 %v1379_v19, %v1309_v22 }
 0x20a   :  { %v1450_v23 = vpop.f32.mrf.mxu1  ;;  %v1381_v24 = vpop.f32.mrf.mxu0 }
 0x20b   :  { %v1382_v28 = vadd.f32 %v1381_v24, %v1311_v25  ;;  %v1451_v30 = vadd.f32 %v1450_v23, %v1380_v26 }
 0x20c   :  { %v1452_v29 = vpop.f32.mrf.mxu1 }
 0x20d   :  { %v1453_v33 = vadd.f32 %v1452_v29, %v1382_v28 }
 0x24a   :  { %v1521_v27 = vpop.f32.mrf.mxu0 }
 0x24b   :  { %v1522_v34 = vadd.f32 %v1521_v27, %v1451_v30 }
 0x24c   :  { %v1592_v31 = vpop.f32.mrf.mxu1  ;;  %v1523_v32 = vpop.f32.mrf.mxu0 }
 0x24d   :  { %v1524_v35 = vadd.f32 %v1523_v32, %v1453_v33  ;;  %v1593_v37 = vadd.f32 %v1592_v31, %v1522_v34 }
 0x24e   :  { %v1594_v36 = vpop.f32.mrf.mxu1 }
 0x24f   :  { %v1595_v40 = vadd.f32 %v1594_v36, %v1524_v35 }
 0x28c   :  { %v1663_v38 = vpop.f32.mrf.mxu0 }
 0x28d   :  { %v1734_v39 = vpop.f32.mrf.mxu1  ;;  %v1664_v41 = vadd.f32 %v1663_v38, %v1593_v37 }
 0x28e   :  { %v1665_v42 = vpop.f32.mrf.mxu0 }
 0x28f   :  { %v1666_v43 = vadd.f32 %v1665_v42, %v1595_v40  ;;  %v1735_v44 = vadd.f32 %v1734_v39, %v1664_v41  ;;  %v1736_v45 = vpop.f32.mrf.mxu1 }
 0x291   :  { %v1737_v46 = vadd.f32 %v1736_v45, %v1666_v43  ;;  %v1739_v48 = vmax.f32 %v1735_v44, 0.0 }
 0x293   :  { %v1740_v47 = vmax.f32 %v1737_v46, 0.0 }
 0x295   :  { %1844 = vmatprep.mubr.f32.mxu0 %v1740_v47 }
 0x296   :  { %1845 = vmatmul.mubr.f32.vlgmr.msra.gmra.mxu0 %v1739_v48 }
 0x356   :  { %v1901_v49 = vpop.f32.mrf.mxu0 }
 0x358   :  { %v1902_v51 = vpop.f32.mrf.mxu0 }
 0x359   :  { %v1903_v52 = vadd.f32 %v1902_v51, %v1901_v49 }
 0x35b   :  { %v1847_v53 = vadd.f32 %v1903_v52, %v1868_v50 }
 0x35d   :  { %1850 = vst [vmem:[#allocation11] sm:$0xff] %v1847_v53 }
 0x35e   :  { %2025 = shalt.err (!%p2022_p1)
}
 0x35f   :  { %1860 = dma.vmem_to_hbm [thread:$0]  %s1858_s4, 128, %s2105_s5, [#allocation4]  }
 0x360   :  { %2040 = dma.done.wait [#allocation4], 128  }
 0x361   :  { %2041 = vsyncadd [#allocation4], 4294967168 }
 0x362   :  { %1864 = vsyncpa [#allocation3], 1 }
 0x363   :  { %1865 = vsyncpa [#allocation6], 1 }
 0x364   :  { %1866 = vsyncpa [#allocation9], 1 }
 0x365   :  { %1867 = vsyncpa [#allocation4], 1 }

</bundles_post_ra>
